<compile_context>
chip_gen: v5e
topology: v5e:2x2
jax: 0.10.0
libtpu: 0.0.40
codegen_flags: <defaults>
</compile_context>

<pallas_src>
import jax
import jax.numpy as jnp
import numpy as np
from jax.experimental import pallas as pl
from jax.experimental.pallas import tpu as pltpu


def round_up(x, m):
    return ((x + m - 1) // m) * m


# Packed-weight index constants (gate order r, z, n as in PyTorch).
R, Z, N = 0, 1, 2
W0C, W0H, W1I, W1H = 0, 3, 6, 9       # offsets into the (12, H, H) square-weight stack
B0, B1 = 0, 4                          # offsets into the (8, 1, H) bias stack


def decoder_kernel(tok_ref,                       # SMEM (B,) int32   scalar prefetch
                   hid_ref, ctx_ref,              # VMEM (2,B,H) f32, (B,H) f32
                   emb_hbm_ref,                   # HBM  (V,E) f32    (pl.ANY, manual DMA)
                   w0e_ref,                       # VMEM (3,E,H)  bf16  l0 W_ih emb-cols, per gate, transposed
                   wsq_ref,                       # VMEM (12,H,H) bf16  [l0 W_ih ctx-cols | l0 W_hh | l1 W_ih | l1 W_hh]
                   b_ref,                         # VMEM (8,1,H)  f32   per layer: [b_ir+b_hr, b_iz+b_hz, b_in, b_hn]
                   wf_hc_ref, wf_e_ref, fcb_ref,  # VMEM (2,H,TN) bf16, (E,TN) bf16, (1,TN) f32
                   pred_ref, hid_out_ref,         # VMEM (B,TN) f32, (2,B,H) f32 (aliased with hid_ref)
                   emb_scr,                       # VMEM (B,E) f32   gathered embedding rows (DMA dst)
                   emb_bf, ctx_bf, h1_bf,         # VMEM bf16 caches of the fc_out activations
                   sem):                          # DMA semaphores (B,)
    j = pl.program_id(0)

    def mm(x, w):  # bf16 x bf16 matmul, f32 accumulation
        return jnp.dot(x, w, preferred_element_type=jnp.float32)

    # ---------------- GRU (runs once, at the first vocab tile) ----------------
    @pl.when(j == 0)
    def _gru_once():
        B = emb_scr.shape[0]

        # Fused embedding gather: B row-DMAs HBM -> VMEM scratch (dropout == identity, eval).
        copies = []
        for b in range(B):
            tok = tok_ref[b]
            cp = pltpu.make_async_copy(
                emb_hbm_ref.at[pl.ds(tok, 1), :],
                emb_scr.at[pl.ds(b, 1), :],
                sem.at[b])
            cp.start()
            copies.append(cp)

        ctx = ctx_ref[...]                        # (B, H) f32
        ctx_b = ctx.astype(jnp.bfloat16)
        h0 = hid_ref[0]
        h0_b = h0.astype(jnp.bfloat16)

        # ----- layer 0: hidden-/context-side contractions (independent of emb) -----
        # These run while the embedding gather DMAs are still in flight.
        gh_r = mm(h0_b, wsq_ref[W0H + R])
        gh_z = mm(h0_b, wsq_ref[W0H + Z])
        gh_n = mm(h0_b, wsq_ref[W0H + N]) + b_ref[B0 + 3]
        gc_r = mm(ctx_b, wsq_ref[W0C + R]) + b_ref[B0 + 0]
        gc_z = mm(ctx_b, wsq_ref[W0C + Z]) + b_ref[B0 + 1]
        gc_n = mm(ctx_b, wsq_ref[W0C + N]) + b_ref[B0 + 2]

        for cp in copies:
            cp.wait()
        emb = emb_scr[...]                        # (B, E) f32
        emb_b = emb.astype(jnp.bfloat16)

        # ----- layer 0: x = [emb | ctx]  (split contractions, no lane concat) -----
        gi_r = mm(emb_b, w0e_ref[R]) + gc_r
        gi_z = mm(emb_b, w0e_ref[Z]) + gc_z
        gi_n = mm(emb_b, w0e_ref[N]) + gc_n
        r = jax.nn.sigmoid(gi_r + gh_r)
        z = jax.nn.sigmoid(gi_z + gh_z)
        n = jnp.tanh(gi_n + r * gh_n)
        h0_new = (1.0 - z) * n + z * h0

        # ----- layer 1 (inter-layer dropout == identity in eval mode) -----
        h1 = hid_ref[1]
        h1_b = h1.astype(jnp.bfloat16)
        x1_b = h0_new.astype(jnp.bfloat16)
        gi_r = mm(x1_b, wsq_ref[W1I + R]) + b_ref[B1 + 0]
        gi_z = mm(x1_b, wsq_ref[W1I + Z]) + b_ref[B1 + 1]
        gi_n = mm(x1_b, wsq_ref[W1I + N]) + b_ref[B1 + 2]
        gh_r = mm(h1_b, wsq_ref[W1H + R])
        gh_z = mm(h1_b, wsq_ref[W1H + Z])
        gh_n = mm(h1_b, wsq_ref[W1H + N]) + b_ref[B1 + 3]
        r = jax.nn.sigmoid(gi_r + gh_r)
        z = jax.nn.sigmoid(gi_z + gh_z)
        n = jnp.tanh(gi_n + r * gh_n)
        h1_new = (1.0 - z) * n + z * h1

        hid_out_ref[0] = h0_new
        hid_out_ref[1] = h1_new

        # bf16 activation caches reused by every vocab tile of fc_out.
        emb_bf[...] = emb_b
        ctx_bf[...] = ctx_b
        h1_bf[...] = h1_new.astype(jnp.bfloat16)

    # --------- fc_out for the current vocab tile: [h1 | emb | ctx] @ W^T + b ---------
    pred_ref[...] = (mm(h1_bf[...], wf_hc_ref[0])
                     + mm(emb_bf[...], wf_e_ref[...])
                     + mm(ctx_bf[...], wf_hc_ref[1])
                     + fcb_ref[...])


def prepare_decoder_params(params, weight_dtype=jnp.bfloat16):
    """One-time packing of PyTorch-layout Decoder params into kernel-ready arrays.

    All transposes / gate splits / bias fusions / dtype casts happen here, once,
    instead of on every decode step.
    """
    E = params["embedding"].shape[1]
    H = params["w_hh_l0"].shape[1]
    V = params["fc_w"].shape[0]

    def per_gate_T(w):  # (3H, K) -> (3, K, H), gate order (r, z, n)
        return jnp.stack([w[g * H:(g + 1) * H, :].T for g in range(3)], axis=0)

    wih0 = per_gate_T(params["w_ih_l0"])              # (3, E+H, H)
    w0e = wih0[:, :E, :].astype(weight_dtype)         # emb columns of layer-0 W_ih
    w0c = wih0[:, E:, :]                              # ctx columns of layer-0 W_ih
    w0h = per_gate_T(params["w_hh_l0"])
    w1i = per_gate_T(params["w_ih_l1"])
    w1h = per_gate_T(params["w_hh_l1"])
    wsq = jnp.concatenate([w0c, w0h, w1i, w1h], axis=0).astype(weight_dtype)  # (12,H,H)

    def pack_biases(bi, bh):
        return jnp.stack([bi[:H] + bh[:H],            # r: b_ir + b_hr
                          bi[H:2 * H] + bh[H:2 * H],  # z: b_iz + b_hz
                          bi[2 * H:],                 # n (input side)
                          bh[2 * H:]], axis=0)        # n (hidden side, inside r*(...))
    biases = jnp.concatenate([pack_biases(params["b_ih_l0"], params["b_hh_l0"]),
                              pack_biases(params["b_ih_l1"], params["b_hh_l1"])], axis=0)
    biases = biases[:, None, :].astype(jnp.float32)   # (8, 1, H)

    # fc_out input feature order is [h1 | emb | ctx]; split, transpose, pad V to tile.
    fc_w = params["fc_w"]
    wf_h = fc_w[:, :H].T                              # (H, V)
    wf_e = fc_w[:, H:H + E].T                         # (E, V)
    wf_c = fc_w[:, H + E:].T                          # (H, V)
    fcb = params["fc_b"]

    TN = min(1024, round_up(V, 128))                  # lane-dense vocab tile (big DMA, fits VMEM)
    V_pad = round_up(V, TN)
    pad = V_pad - V
    if pad:
        wf_h = jnp.pad(wf_h, ((0, 0), (0, pad)))
        wf_e = jnp.pad(wf_e, ((0, 0), (0, pad)))
        wf_c = jnp.pad(wf_c, ((0, 0), (0, pad)))
        fcb = jnp.pad(fcb, (0, pad))
    wf_hc = jnp.stack([wf_h, wf_c], axis=0).astype(weight_dtype)   # (2, H, V_pad)
    wf_e = wf_e.astype(weight_dtype)                               # (E, V_pad)
    fcb = fcb[None, :].astype(jnp.float32)                         # (1, V_pad)

    return {
        "emb_table": params["embedding"].astype(jnp.float32),      # stays in HBM (row-gather DMA)
        "w0e": w0e, "wsq": wsq, "biases": biases,
        "wf_hc": wf_hc, "wf_e": wf_e, "fcb": fcb,
        "E": E, "H": H, "V": V, "V_pad": V_pad, "TN": TN,
    }


def decoder_forward(input_tokens, hidden, context, prep):
    """
    input_tokens: (B,) int32 token ids
    hidden:       (2, B, H) float32  (its padded copy is donated/aliased to the new hidden)
    context:      (1, B, H) float32
    returns (prediction (B, V), new_hidden (2, B, H))
    """
    E, H, V = prep["E"], prep["H"], prep["V"]
    V_pad, TN = prep["V_pad"], prep["TN"]
    B = input_tokens.shape[0]
    B_pad = round_up(max(B, 8), 8)
    pad_b = B_pad - B

    tokens = jnp.asarray(input_tokens, jnp.int32)
    ctx = context[0].astype(jnp.float32)
    hid = hidden.astype(jnp.float32)
    if pad_b:
        tokens = jnp.pad(tokens, (0, pad_b))                  # pad with token 0 (valid row)
        ctx = jnp.pad(ctx, ((0, pad_b), (0, 0)))
        hid = jnp.pad(hid, ((0, 0), (0, pad_b), (0, 0)))

    n_v_tiles = V_pad // TN

    grid_spec = pltpu.PrefetchScalarGridSpec(
        num_scalar_prefetch=1,
        grid=(n_v_tiles,),
        in_specs=[
            pl.BlockSpec((2, B_pad, H), lambda j, tok: (0, 0, 0)),     # hidden (resident)
            pl.BlockSpec((B_pad, H), lambda j, tok: (0, 0)),           # context (resident)
            pl.BlockSpec(memory_space=pl.ANY),                         # embedding table (HBM)
            pl.BlockSpec((3, E, H), lambda j, tok: (0, 0, 0)),         # w0e
            pl.BlockSpec((12, H, H), lambda j, tok: (0, 0, 0)),        # wsq (all square GRU weights)
            pl.BlockSpec((8, 1, H), lambda j, tok: (0, 0, 0)),         # packed biases
            pl.BlockSpec((2, H, TN), lambda j, tok: (0, 0, j)),        # fc W (h1 / ctx blocks), vocab-tiled
            pl.BlockSpec((E, TN), lambda j, tok: (0, j)),              # fc W (emb block), vocab-tiled
            pl.BlockSpec((1, TN), lambda j, tok: (0, j)),              # fc bias, vocab-tiled
        ],
        out_specs=(
            pl.BlockSpec((B_pad, TN), lambda j, tok: (0, j)),          # prediction tile
            pl.BlockSpec((2, B_pad, H), lambda j, tok: (0, 0, 0)),     # new hidden (written at j==0)
        ),
        scratch_shapes=[
            pltpu.VMEM((B_pad, E), jnp.float32),     # gathered embedding rows (DMA dst)
            pltpu.VMEM((B_pad, E), jnp.bfloat16),    # emb bf16 cache for fc_out
            pltpu.VMEM((B_pad, H), jnp.bfloat16),    # ctx bf16 cache for fc_out
            pltpu.VMEM((B_pad, H), jnp.bfloat16),    # h1_new bf16 cache for fc_out
            pltpu.SemaphoreType.DMA((B_pad,)),       # embedding row-gather semaphores
        ],
    )

    flops = 2 * (3 * B_pad * E * H + 12 * B_pad * H * H + B_pad * V_pad * (2 * H + E))
    bytes_accessed = int(
        2 * (prep["w0e"].size + prep["wsq"].size + prep["wf_hc"].size + prep["wf_e"].size)
        + 4 * (prep["biases"].size + prep["fcb"].size)
        + 4 * (2 * 2 * B_pad * H + B_pad * H + B_pad * E + B_pad * V_pad))
    cost = pl.CostEstimate(flops=int(flops),
                           transcendentals=int(6 * B_pad * H),
                           bytes_accessed=bytes_accessed)

    pred, hid_new = pl.pallas_call(
        decoder_kernel,
        grid_spec=grid_spec,
        out_shape=(
            jax.ShapeDtypeStruct((B_pad, V_pad), jnp.float32),
            jax.ShapeDtypeStruct((2, B_pad, H), jnp.float32),
        ),
        # hidden (input index 1, counting the scalar-prefetch tokens at 0) -> new hidden (output 1)
        input_output_aliases={1: 1},
        compiler_params=pltpu.CompilerParams(
            dimension_semantics=("arbitrary",),      # vocab tiles reuse the j==0 GRU scratch
            vmem_limit_bytes=32 * 1024 * 1024,
        ),
        cost_estimate=cost,
    )(tokens, hid, ctx, prep["emb_table"],
      prep["w0e"], prep["wsq"], prep["biases"],
      prep["wf_hc"], prep["wf_e"], prep["fcb"])

    return pred[:B, :V], hid_new[:, :B, :]


def make_params(key, output_dim, emb_dim, hid_dim):
    ks = jax.random.split(key, 12)
    s = 0.1
    return {
        "embedding": s * jax.random.normal(ks[0], (output_dim, emb_dim), jnp.float32),
        # GRU layer 0: input size = emb_dim + hid_dim
        "w_ih_l0": s * jax.random.normal(ks[1], (3 * hid_dim, emb_dim + hid_dim), jnp.float32),
        "w_hh_l0": s * jax.random.normal(ks[2], (3 * hid_dim, hid_dim), jnp.float32),
        "b_ih_l0": s * jax.random.normal(ks[3], (3 * hid_dim,), jnp.float32),
        "b_hh_l0": s * jax.random.normal(ks[4], (3 * hid_dim,), jnp.float32),
        # GRU layer 1: input size = hid_dim
        "w_ih_l1": s * jax.random.normal(ks[5], (3 * hid_dim, hid_dim), jnp.float32),
        "w_hh_l1": s * jax.random.normal(ks[6], (3 * hid_dim, hid_dim), jnp.float32),
        "b_ih_l1": s * jax.random.normal(ks[7], (3 * hid_dim,), jnp.float32),
        "b_hh_l1": s * jax.random.normal(ks[8], (3 * hid_dim,), jnp.float32),
        # fc_out: (output_dim, emb_dim + 2*hid_dim), feature order [h1 | emb | ctx]
        "fc_w": s * jax.random.normal(ks[9], (output_dim, emb_dim + 2 * hid_dim), jnp.float32),
        "fc_b": s * jax.random.normal(ks[10], (output_dim,), jnp.float32),
    }


def decoder_forward_ref(input_tokens, hidden, context, params):
    """Pure-JAX f32 reference (eval-mode dropout) for correctness check."""
    H = hidden.shape[2]
    emb = jnp.take(params["embedding"], input_tokens, axis=0)
    ctx = context[0]

    def cell(x, h, wih, whh, bih, bhh):
        gi = x @ wih.T + bih
        gh = h @ whh.T + bhh
        r = jax.nn.sigmoid(gi[:, :H] + gh[:, :H])
        z = jax.nn.sigmoid(gi[:, H:2 * H] + gh[:, H:2 * H])
        n = jnp.tanh(gi[:, 2 * H:] + r * gh[:, 2 * H:])
        return (1 - z) * n + z * h

    x0 = jnp.concatenate([emb, ctx], axis=1)
    h0 = cell(x0, hidden[0], params["w_ih_l0"], params["w_hh_l0"],
              params["b_ih_l0"], params["b_hh_l0"])
    h1 = cell(h0, hidden[1], params["w_ih_l1"], params["w_hh_l1"],
              params["b_ih_l1"], params["b_hh_l1"])
    feats = jnp.concatenate([h1, emb, ctx], axis=1)
    pred = feats @ params["fc_w"].T + params["fc_b"]
    return pred, jnp.stack([h0, h1], axis=0)


if __name__ == "__main__":
    output_dim = 128   # vocab size (len(sp_model))
    emb_dim = 32
    hid_dim = 64
    n_layers = 2
    batch = 4

    key = jax.random.PRNGKey(0)
    k_p, k_tok, k_hid, k_ctx = jax.random.split(key, 4)

    params = make_params(k_p, output_dim, emb_dim, hid_dim)
    tokens = jax.random.randint(k_tok, (batch,), 0, output_dim, dtype=jnp.int32)
    hidden = 0.1 * jax.random.normal(k_hid, (n_layers, batch, hid_dim), jnp.float32)
    context = 0.1 * jax.random.normal(k_ctx, (1, batch, hid_dim), jnp.float32)

    # Compute the f32 reference first (the kernel aliases / donates its hidden-state buffer).
    pred_ref, hidden_ref = decoder_forward_ref(tokens, hidden, context, params)

    prep = prepare_decoder_params(params)
    pred, new_hidden = decoder_forward(tokens, hidden, context, prep)
    pred = jax.block_until_ready(pred)
    new_hidden = jax.block_until_ready(new_hidden)

    # bf16 weights in the kernel vs f32 reference -> relaxed tolerances.
    np.testing.assert_allclose(np.asarray(pred), np.asarray(pred_ref), rtol=2e-2, atol=1e-2)
    np.testing.assert_allclose(np.asarray(new_hidden), np.asarray(hidden_ref), rtol=2e-2, atol=1e-2)

    assert pred.shape == (batch, output_dim)
    assert new_hidden.shape == (n_layers, batch, hid_dim)
    print("KERNEL_OK")
</pallas_src>

<mosaic_0001>
module attributes {stable_mosaic.version = 11 : i64} {
  func.func @decoder_kernel(%arg0: i32, %arg1: memref<8xi32, #tpu.memory_space<smem>>, %arg2: memref<2x8x64xf32, #tpu.memory_space<vmem>>, %arg3: memref<8x64xf32, #tpu.memory_space<vmem>>, %arg4: memref<128x32xf32, #tpu.memory_space<any>>, %arg5: memref<3x32x64xbf16, #tpu.memory_space<vmem>>, %arg6: memref<12x64x64xbf16, #tpu.memory_space<vmem>>, %arg7: memref<8x1x64xf32, #tpu.memory_space<vmem>>, %arg8: memref<2x64x128xbf16, #tpu.memory_space<vmem>>, %arg9: memref<32x128xbf16, #tpu.memory_space<vmem>>, %arg10: memref<1x128xf32, #tpu.memory_space<vmem>>, %arg11: memref<8x128xf32, #tpu.memory_space<vmem>>, %arg12: memref<2x8x64xf32, #tpu.memory_space<vmem>>, %arg13: memref<8x32xf32, #tpu.memory_space<vmem>>, %arg14: memref<8x32xbf16, #tpu.memory_space<vmem>>, %arg15: memref<8x64xbf16, #tpu.memory_space<vmem>>, %arg16: memref<8x64xbf16, #tpu.memory_space<vmem>>, %arg17: memref<8x!tpu.dma_semaphore, #tpu.memory_space<semaphore_mem>>) attributes {dimension_semantics = [#tpu.dimension_semantics<arbitrary>], iteration_bounds = array<i64: 1>, scalar_prefetch = 1 : i64, scratch_operands = 5 : i64, tpu.core_type = #tpu.core_type<tc>, window_params = [{pipeline_mode = #tpu.pipeline_mode<synchronous>, transform_indices = @transform_0, window_bounds = array<i64: 2, 8, 64>}, {pipeline_mode = #tpu.pipeline_mode<synchronous>, transform_indices = @transform_1, window_bounds = array<i64: 8, 64>}, {}, {pipeline_mode = #tpu.pipeline_mode<synchronous>, transform_indices = @transform_3, window_bounds = array<i64: 3, 32, 64>}, {pipeline_mode = #tpu.pipeline_mode<synchronous>, transform_indices = @transform_4, window_bounds = array<i64: 12, 64, 64>}, {pipeline_mode = #tpu.pipeline_mode<synchronous>, transform_indices = @transform_5, window_bounds = array<i64: 8, 1, 64>}, {transform_indices = @transform_6, window_bounds = array<i64: 2, 64, 128>}, {transform_indices = @transform_7, window_bounds = array<i64: 32, 128>}, {transform_indices = @transform_8, window_bounds = array<i64: 1, 128>}, {transform_indices = @transform_9, window_bounds = array<i64: 8, 128>}, {pipeline_mode = #tpu.pipeline_mode<synchronous>, transform_indices = @transform_10, window_bounds = array<i64: 2, 8, 64>}]} {
    %c0_i32 = arith.constant 0 : i32
    %0 = arith.cmpi eq, %arg0, %c0_i32 : i32
    %1 = arith.extui %0 : i1 to i32
    %c0_i32_0 = arith.constant 0 : i32
    %2 = arith.cmpi ne, %1, %c0_i32_0 : i32
    scf.if %2 {
      %c0_19 = arith.constant 0 : index
      %20 = memref.load %arg1[%c0_19] : memref<8xi32, #tpu.memory_space<smem>>
      %c0_i32_20 = arith.constant 0 : i32
      %c0_i32_21 = arith.constant 0 : i32
      %21 = tpu.memref_slice %arg4[%20, %c0_i32_21] : memref<128x32xf32, #tpu.memory_space<any>> -> memref<1x32xf32, #tpu.memory_space<any>>
      %c0_i32_22 = arith.constant 0 : i32
      %c0_i32_23 = arith.constant 0 : i32
      %22 = tpu.memref_slice %arg13[%c0_i32_22, %c0_i32_23] : memref<8x32xf32, #tpu.memory_space<vmem>> -> memref<1x32xf32, #tpu.memory_space<vmem>>
      %23 = tpu.memref_slice %arg17[%c0_i32_20] : memref<8x!tpu.dma_semaphore, #tpu.memory_space<semaphore_mem>> -> memref<1x!tpu.dma_semaphore, #tpu.memory_space<semaphore_mem>>
      %24 = tpu.memref_squeeze %23 : memref<1x!tpu.dma_semaphore, #tpu.memory_space<semaphore_mem>> -> memref<!tpu.dma_semaphore, #tpu.memory_space<semaphore_mem>>
      tpu.enqueue_dma source(%21 : memref<1x32xf32, #tpu.memory_space<any>>) target(%22 : memref<1x32xf32, #tpu.memory_space<vmem>>) target_semaphore(%24 : memref<!tpu.dma_semaphore, #tpu.memory_space<semaphore_mem>>)
      %c1_24 = arith.constant 1 : index
      %25 = memref.load %arg1[%c1_24] : memref<8xi32, #tpu.memory_space<smem>>
      %c1_i32 = arith.constant 1 : i32
      %c0_i32_25 = arith.constant 0 : i32
      %26 = tpu.memref_slice %arg4[%25, %c0_i32_25] : memref<128x32xf32, #tpu.memory_space<any>> -> memref<1x32xf32, #tpu.memory_space<any>>
      %c1_i32_26 = arith.constant 1 : i32
      %c0_i32_27 = arith.constant 0 : i32
      %27 = tpu.memref_slice %arg13[%c1_i32_26, %c0_i32_27] : memref<8x32xf32, #tpu.memory_space<vmem>> -> memref<1x32xf32, #tpu.memory_space<vmem>>
      %28 = tpu.memref_slice %arg17[%c1_i32] : memref<8x!tpu.dma_semaphore, #tpu.memory_space<semaphore_mem>> -> memref<1x!tpu.dma_semaphore, #tpu.memory_space<semaphore_mem>>
      %29 = tpu.memref_squeeze %28 : memref<1x!tpu.dma_semaphore, #tpu.memory_space<semaphore_mem>> -> memref<!tpu.dma_semaphore, #tpu.memory_space<semaphore_mem>>
      tpu.enqueue_dma source(%26 : memref<1x32xf32, #tpu.memory_space<any>>) target(%27 : memref<1x32xf32, #tpu.memory_space<vmem>>) target_semaphore(%29 : memref<!tpu.dma_semaphore, #tpu.memory_space<semaphore_mem>>)
      %c2 = arith.constant 2 : index
      %30 = memref.load %arg1[%c2] : memref<8xi32, #tpu.memory_space<smem>>
      %c2_i32 = arith.constant 2 : i32
      %c0_i32_28 = arith.constant 0 : i32
      %31 = tpu.memref_slice %arg4[%30, %c0_i32_28] : memref<128x32xf32, #tpu.memory_space<any>> -> memref<1x32xf32, #tpu.memory_space<any>>
      %c2_i32_29 = arith.constant 2 : i32
      %c0_i32_30 = arith.constant 0 : i32
      %32 = tpu.memref_slice %arg13[%c2_i32_29, %c0_i32_30] : memref<8x32xf32, #tpu.memory_space<vmem>> -> memref<1x32xf32, #tpu.memory_space<vmem>>
      %33 = tpu.memref_slice %arg17[%c2_i32] : memref<8x!tpu.dma_semaphore, #tpu.memory_space<semaphore_mem>> -> memref<1x!tpu.dma_semaphore, #tpu.memory_space<semaphore_mem>>
      %34 = tpu.memref_squeeze %33 : memref<1x!tpu.dma_semaphore, #tpu.memory_space<semaphore_mem>> -> memref<!tpu.dma_semaphore, #tpu.memory_space<semaphore_mem>>
      tpu.enqueue_dma source(%31 : memref<1x32xf32, #tpu.memory_space<any>>) target(%32 : memref<1x32xf32, #tpu.memory_space<vmem>>) target_semaphore(%34 : memref<!tpu.dma_semaphore, #tpu.memory_space<semaphore_mem>>)
      %c3 = arith.constant 3 : index
      %35 = memref.load %arg1[%c3] : memref<8xi32, #tpu.memory_space<smem>>
      %c3_i32 = arith.constant 3 : i32
      %c0_i32_31 = arith.constant 0 : i32
      %36 = tpu.memref_slice %arg4[%35, %c0_i32_31] : memref<128x32xf32, #tpu.memory_space<any>> -> memref<1x32xf32, #tpu.memory_space<any>>
      %c3_i32_32 = arith.constant 3 : i32
      %c0_i32_33 = arith.constant 0 : i32
      %37 = tpu.memref_slice %arg13[%c3_i32_32, %c0_i32_33] : memref<8x32xf32, #tpu.memory_space<vmem>> -> memref<1x32xf32, #tpu.memory_space<vmem>>
      %38 = tpu.memref_slice %arg17[%c3_i32] : memref<8x!tpu.dma_semaphore, #tpu.memory_space<semaphore_mem>> -> memref<1x!tpu.dma_semaphore, #tpu.memory_space<semaphore_mem>>
      %39 = tpu.memref_squeeze %38 : memref<1x!tpu.dma_semaphore, #tpu.memory_space<semaphore_mem>> -> memref<!tpu.dma_semaphore, #tpu.memory_space<semaphore_mem>>
      tpu.enqueue_dma source(%36 : memref<1x32xf32, #tpu.memory_space<any>>) target(%37 : memref<1x32xf32, #tpu.memory_space<vmem>>) target_semaphore(%39 : memref<!tpu.dma_semaphore, #tpu.memory_space<semaphore_mem>>)
      %c4 = arith.constant 4 : index
      %40 = memref.load %arg1[%c4] : memref<8xi32, #tpu.memory_space<smem>>
      %c4_i32 = arith.constant 4 : i32
      %c0_i32_34 = arith.constant 0 : i32
      %41 = tpu.memref_slice %arg4[%40, %c0_i32_34] : memref<128x32xf32, #tpu.memory_space<any>> -> memref<1x32xf32, #tpu.memory_space<any>>
      %c4_i32_35 = arith.constant 4 : i32
      %c0_i32_36 = arith.constant 0 : i32
      %42 = tpu.memref_slice %arg13[%c4_i32_35, %c0_i32_36] : memref<8x32xf32, #tpu.memory_space<vmem>> -> memref<1x32xf32, #tpu.memory_space<vmem>>
      %43 = tpu.memref_slice %arg17[%c4_i32] : memref<8x!tpu.dma_semaphore, #tpu.memory_space<semaphore_mem>> -> memref<1x!tpu.dma_semaphore, #tpu.memory_space<semaphore_mem>>
      %44 = tpu.memref_squeeze %43 : memref<1x!tpu.dma_semaphore, #tpu.memory_space<semaphore_mem>> -> memref<!tpu.dma_semaphore, #tpu.memory_space<semaphore_mem>>
      tpu.enqueue_dma source(%41 : memref<1x32xf32, #tpu.memory_space<any>>) target(%42 : memref<1x32xf32, #tpu.memory_space<vmem>>) target_semaphore(%44 : memref<!tpu.dma_semaphore, #tpu.memory_space<semaphore_mem>>)
      %c5 = arith.constant 5 : index
      %45 = memref.load %arg1[%c5] : memref<8xi32, #tpu.memory_space<smem>>
      %c5_i32 = arith.constant 5 : i32
      %c0_i32_37 = arith.constant 0 : i32
      %46 = tpu.memref_slice %arg4[%45, %c0_i32_37] : memref<128x32xf32, #tpu.memory_space<any>> -> memref<1x32xf32, #tpu.memory_space<any>>
      %c5_i32_38 = arith.constant 5 : i32
      %c0_i32_39 = arith.constant 0 : i32
      %47 = tpu.memref_slice %arg13[%c5_i32_38, %c0_i32_39] : memref<8x32xf32, #tpu.memory_space<vmem>> -> memref<1x32xf32, #tpu.memory_space<vmem>>
      %48 = tpu.memref_slice %arg17[%c5_i32] : memref<8x!tpu.dma_semaphore, #tpu.memory_space<semaphore_mem>> -> memref<1x!tpu.dma_semaphore, #tpu.memory_space<semaphore_mem>>
      %49 = tpu.memref_squeeze %48 : memref<1x!tpu.dma_semaphore, #tpu.memory_space<semaphore_mem>> -> memref<!tpu.dma_semaphore, #tpu.memory_space<semaphore_mem>>
      tpu.enqueue_dma source(%46 : memref<1x32xf32, #tpu.memory_space<any>>) target(%47 : memref<1x32xf32, #tpu.memory_space<vmem>>) target_semaphore(%49 : memref<!tpu.dma_semaphore, #tpu.memory_space<semaphore_mem>>)
      %c6 = arith.constant 6 : index
      %50 = memref.load %arg1[%c6] : memref<8xi32, #tpu.memory_space<smem>>
      %c6_i32 = arith.constant 6 : i32
      %c0_i32_40 = arith.constant 0 : i32
      %51 = tpu.memref_slice %arg4[%50, %c0_i32_40] : memref<128x32xf32, #tpu.memory_space<any>> -> memref<1x32xf32, #tpu.memory_space<any>>
      %c6_i32_41 = arith.constant 6 : i32
      %c0_i32_42 = arith.constant 0 : i32
      %52 = tpu.memref_slice %arg13[%c6_i32_41, %c0_i32_42] : memref<8x32xf32, #tpu.memory_space<vmem>> -> memref<1x32xf32, #tpu.memory_space<vmem>>
      %53 = tpu.memref_slice %arg17[%c6_i32] : memref<8x!tpu.dma_semaphore, #tpu.memory_space<semaphore_mem>> -> memref<1x!tpu.dma_semaphore, #tpu.memory_space<semaphore_mem>>
      %54 = tpu.memref_squeeze %53 : memref<1x!tpu.dma_semaphore, #tpu.memory_space<semaphore_mem>> -> memref<!tpu.dma_semaphore, #tpu.memory_space<semaphore_mem>>
      tpu.enqueue_dma source(%51 : memref<1x32xf32, #tpu.memory_space<any>>) target(%52 : memref<1x32xf32, #tpu.memory_space<vmem>>) target_semaphore(%54 : memref<!tpu.dma_semaphore, #tpu.memory_space<semaphore_mem>>)
      %c7 = arith.constant 7 : index
      %55 = memref.load %arg1[%c7] : memref<8xi32, #tpu.memory_space<smem>>
      %c7_i32 = arith.constant 7 : i32
      %c0_i32_43 = arith.constant 0 : i32
      %56 = tpu.memref_slice %arg4[%55, %c0_i32_43] : memref<128x32xf32, #tpu.memory_space<any>> -> memref<1x32xf32, #tpu.memory_space<any>>
      %c7_i32_44 = arith.constant 7 : i32
      %c0_i32_45 = arith.constant 0 : i32
      %57 = tpu.memref_slice %arg13[%c7_i32_44, %c0_i32_45] : memref<8x32xf32, #tpu.memory_space<vmem>> -> memref<1x32xf32, #tpu.memory_space<vmem>>
      %58 = tpu.memref_slice %arg17[%c7_i32] : memref<8x!tpu.dma_semaphore, #tpu.memory_space<semaphore_mem>> -> memref<1x!tpu.dma_semaphore, #tpu.memory_space<semaphore_mem>>
      %59 = tpu.memref_squeeze %58 : memref<1x!tpu.dma_semaphore, #tpu.memory_space<semaphore_mem>> -> memref<!tpu.dma_semaphore, #tpu.memory_space<semaphore_mem>>
      tpu.enqueue_dma source(%56 : memref<1x32xf32, #tpu.memory_space<any>>) target(%57 : memref<1x32xf32, #tpu.memory_space<vmem>>) target_semaphore(%59 : memref<!tpu.dma_semaphore, #tpu.memory_space<semaphore_mem>>)
      %c0_46 = arith.constant 0 : index
      %c0_47 = arith.constant 0 : index
      %60 = vector.load %arg3[%c0_46, %c0_47] : memref<8x64xf32, #tpu.memory_space<vmem>>, vector<8x64xf32>
      %61 = arith.truncf %60 : vector<8x64xf32> to vector<8x64xbf16>
      %c0_48 = arith.constant 0 : index
      %c0_49 = arith.constant 0 : index
      %c0_50 = arith.constant 0 : index
      %62 = vector.load %arg2[%c0_48, %c0_49, %c0_50] : memref<2x8x64xf32, #tpu.memory_space<vmem>>, vector<1x8x64xf32>
      %63 = vector.shape_cast %62 : vector<1x8x64xf32> to vector<8x64xf32>
      %64 = arith.truncf %63 : vector<8x64xf32> to vector<8x64xbf16>
      %c3_51 = arith.constant 3 : index
      %c0_52 = arith.constant 0 : index
      %c0_53 = arith.constant 0 : index
      %65 = vector.load %arg6[%c3_51, %c0_52, %c0_53] : memref<12x64x64xbf16, #tpu.memory_space<vmem>>, vector<1x64x64xbf16>
      %66 = vector.shape_cast %65 : vector<1x64x64xbf16> to vector<64x64xbf16>
      %cst_54 = arith.constant dense<0.000000e+00> : vector<8x64xf32>
      %67 = tpu.matmul %64, %66, %cst_54 {dimension_numbers = #tpu.dot_dimension_numbers<[1], [0], [0], [1], [0, 0, 1, 1], [], []>} : vector<8x64xbf16>, vector<64x64xbf16>, vector<8x64xf32> -> vector<8x64xf32>
      %c4_55 = arith.constant 4 : index
      %c0_56 = arith.constant 0 : index
      %c0_57 = arith.constant 0 : index
      %68 = vector.load %arg6[%c4_55, %c0_56, %c0_57] : memref<12x64x64xbf16, #tpu.memory_space<vmem>>, vector<1x64x64xbf16>
      %69 = vector.shape_cast %68 : vector<1x64x64xbf16> to vector<64x64xbf16>
      %cst_58 = arith.constant dense<0.000000e+00> : vector<8x64xf32>
      %70 = tpu.matmul %64, %69, %cst_58 {dimension_numbers = #tpu.dot_dimension_numbers<[1], [0], [0], [1], [0, 0, 1, 1], [], []>} : vector<8x64xbf16>, vector<64x64xbf16>, vector<8x64xf32> -> vector<8x64xf32>
      %c5_59 = arith.constant 5 : index
      %c0_60 = arith.constant 0 : index
      %c0_61 = arith.constant 0 : index
      %71 = vector.load %arg6[%c5_59, %c0_60, %c0_61] : memref<12x64x64xbf16, #tpu.memory_space<vmem>>, vector<1x64x64xbf16>
      %72 = vector.shape_cast %71 : vector<1x64x64xbf16> to vector<64x64xbf16>
      %cst_62 = arith.constant dense<0.000000e+00> : vector<8x64xf32>
      %73 = tpu.matmul %64, %72, %cst_62 {dimension_numbers = #tpu.dot_dimension_numbers<[1], [0], [0], [1], [0, 0, 1, 1], [], []>} : vector<8x64xbf16>, vector<64x64xbf16>, vector<8x64xf32> -> vector<8x64xf32>
      %c3_63 = arith.constant 3 : index
      %c0_64 = arith.constant 0 : index
      %c0_65 = arith.constant 0 : index
      %74 = vector.load %arg7[%c3_63, %c0_64, %c0_65] : memref<8x1x64xf32, #tpu.memory_space<vmem>>, vector<1x1x64xf32>
      %75 = vector.shape_cast %74 : vector<1x1x64xf32> to vector<1x64xf32>
      %76 = vector.broadcast %75 : vector<1x64xf32> to vector<8x64xf32>
      %77 = arith.addf %73, %76 : vector<8x64xf32>
      %c0_66 = arith.constant 0 : index
      %c0_67 = arith.constant 0 : index
      %c0_68 = arith.constant 0 : index
      %78 = vector.load %arg6[%c0_66, %c0_67, %c0_68] : memref<12x64x64xbf16, #tpu.memory_space<vmem>>, vector<1x64x64xbf16>
      %79 = vector.shape_cast %78 : vector<1x64x64xbf16> to vector<64x64xbf16>
      %cst_69 = arith.constant dense<0.000000e+00> : vector<8x64xf32>
      %80 = tpu.matmul %61, %79, %cst_69 {dimension_numbers = #tpu.dot_dimension_numbers<[1], [0], [0], [1], [0, 0, 1, 1], [], []>} : vector<8x64xbf16>, vector<64x64xbf16>, vector<8x64xf32> -> vector<8x64xf32>
      %c0_70 = arith.constant 0 : index
      %c0_71 = arith.constant 0 : index
      %c0_72 = arith.constant 0 : index
      %81 = vector.load %arg7[%c0_70, %c0_71, %c0_72] : memref<8x1x64xf32, #tpu.memory_space<vmem>>, vector<1x1x64xf32>
      %82 = vector.shape_cast %81 : vector<1x1x64xf32> to vector<1x64xf32>
      %83 = vector.broadcast %82 : vector<1x64xf32> to vector<8x64xf32>
      %84 = arith.addf %80, %83 : vector<8x64xf32>
      %c1_73 = arith.constant 1 : index
      %c0_74 = arith.constant 0 : index
      %c0_75 = arith.constant 0 : index
      %85 = vector.load %arg6[%c1_73, %c0_74, %c0_75] : memref<12x64x64xbf16, #tpu.memory_space<vmem>>, vector<1x64x64xbf16>
      %86 = vector.shape_cast %85 : vector<1x64x64xbf16> to vector<64x64xbf16>
      %cst_76 = arith.constant dense<0.000000e+00> : vector<8x64xf32>
      %87 = tpu.matmul %61, %86, %cst_76 {dimension_numbers = #tpu.dot_dimension_numbers<[1], [0], [0], [1], [0, 0, 1, 1], [], []>} : vector<8x64xbf16>, vector<64x64xbf16>, vector<8x64xf32> -> vector<8x64xf32>
      %c1_77 = arith.constant 1 : index
      %c0_78 = arith.constant 0 : index
      %c0_79 = arith.constant 0 : index
      %88 = vector.load %arg7[%c1_77, %c0_78, %c0_79] : memref<8x1x64xf32, #tpu.memory_space<vmem>>, vector<1x1x64xf32>
      %89 = vector.shape_cast %88 : vector<1x1x64xf32> to vector<1x64xf32>
      %90 = vector.broadcast %89 : vector<1x64xf32> to vector<8x64xf32>
      %91 = arith.addf %87, %90 : vector<8x64xf32>
      %c2_80 = arith.constant 2 : index
      %c0_81 = arith.constant 0 : index
      %c0_82 = arith.constant 0 : index
      %92 = vector.load %arg6[%c2_80, %c0_81, %c0_82] : memref<12x64x64xbf16, #tpu.memory_space<vmem>>, vector<1x64x64xbf16>
      %93 = vector.shape_cast %92 : vector<1x64x64xbf16> to vector<64x64xbf16>
      %cst_83 = arith.constant dense<0.000000e+00> : vector<8x64xf32>
      %94 = tpu.matmul %61, %93, %cst_83 {dimension_numbers = #tpu.dot_dimension_numbers<[1], [0], [0], [1], [0, 0, 1, 1], [], []>} : vector<8x64xbf16>, vector<64x64xbf16>, vector<8x64xf32> -> vector<8x64xf32>
      %c2_84 = arith.constant 2 : index
      %c0_85 = arith.constant 0 : index
      %c0_86 = arith.constant 0 : index
      %95 = vector.load %arg7[%c2_84, %c0_85, %c0_86] : memref<8x1x64xf32, #tpu.memory_space<vmem>>, vector<1x1x64xf32>
      %96 = vector.shape_cast %95 : vector<1x1x64xf32> to vector<1x64xf32>
      %97 = vector.broadcast %96 : vector<1x64xf32> to vector<8x64xf32>
      %98 = arith.addf %94, %97 : vector<8x64xf32>
      %c0_i32_87 = arith.constant 0 : i32
      %c0_i32_88 = arith.constant 0 : i32
      %99 = tpu.memref_slice %arg4[%20, %c0_i32_88] : memref<128x32xf32, #tpu.memory_space<any>> -> memref<1x32xf32, #tpu.memory_space<any>>
      %c0_i32_89 = arith.constant 0 : i32
      %c0_i32_90 = arith.constant 0 : i32
      %100 = tpu.memref_slice %arg13[%c0_i32_89, %c0_i32_90] : memref<8x32xf32, #tpu.memory_space<vmem>> -> memref<1x32xf32, #tpu.memory_space<vmem>>
      %101 = tpu.memref_slice %arg17[%c0_i32_87] : memref<8x!tpu.dma_semaphore, #tpu.memory_space<semaphore_mem>> -> memref<1x!tpu.dma_semaphore, #tpu.memory_space<semaphore_mem>>
      %102 = tpu.memref_squeeze %101 : memref<1x!tpu.dma_semaphore, #tpu.memory_space<semaphore_mem>> -> memref<!tpu.dma_semaphore, #tpu.memory_space<semaphore_mem>>
      tpu.wait_dma2 semaphore(%102 : memref<!tpu.dma_semaphore, #tpu.memory_space<semaphore_mem>>) src(%99 : memref<1x32xf32, #tpu.memory_space<any>>) dst(%100 : memref<1x32xf32, #tpu.memory_space<vmem>>)
      %c1_i32_91 = arith.constant 1 : i32
      %c0_i32_92 = arith.constant 0 : i32
      %103 = tpu.memref_slice %arg4[%25, %c0_i32_92] : memref<128x32xf32, #tpu.memory_space<any>> -> memref<1x32xf32, #tpu.memory_space<any>>
      %c1_i32_93 = arith.constant 1 : i32
      %c0_i32_94 = arith.constant 0 : i32
      %104 = tpu.memref_slice %arg13[%c1_i32_93, %c0_i32_94] : memref<8x32xf32, #tpu.memory_space<vmem>> -> memref<1x32xf32, #tpu.memory_space<vmem>>
      %105 = tpu.memref_slice %arg17[%c1_i32_91] : memref<8x!tpu.dma_semaphore, #tpu.memory_space<semaphore_mem>> -> memref<1x!tpu.dma_semaphore, #tpu.memory_space<semaphore_mem>>
      %106 = tpu.memref_squeeze %105 : memref<1x!tpu.dma_semaphore, #tpu.memory_space<semaphore_mem>> -> memref<!tpu.dma_semaphore, #tpu.memory_space<semaphore_mem>>
      tpu.wait_dma2 semaphore(%106 : memref<!tpu.dma_semaphore, #tpu.memory_space<semaphore_mem>>) src(%103 : memref<1x32xf32, #tpu.memory_space<any>>) dst(%104 : memref<1x32xf32, #tpu.memory_space<vmem>>)
      %c2_i32_95 = arith.constant 2 : i32
      %c0_i32_96 = arith.constant 0 : i32
      %107 = tpu.memref_slice %arg4[%30, %c0_i32_96] : memref<128x32xf32, #tpu.memory_space<any>> -> memref<1x32xf32, #tpu.memory_space<any>>
      %c2_i32_97 = arith.constant 2 : i32
      %c0_i32_98 = arith.constant 0 : i32
      %108 = tpu.memref_slice %arg13[%c2_i32_97, %c0_i32_98] : memref<8x32xf32, #tpu.memory_space<vmem>> -> memref<1x32xf32, #tpu.memory_space<vmem>>
      %109 = tpu.memref_slice %arg17[%c2_i32_95] : memref<8x!tpu.dma_semaphore, #tpu.memory_space<semaphore_mem>> -> memref<1x!tpu.dma_semaphore, #tpu.memory_space<semaphore_mem>>
      %110 = tpu.memref_squeeze %109 : memref<1x!tpu.dma_semaphore, #tpu.memory_space<semaphore_mem>> -> memref<!tpu.dma_semaphore, #tpu.memory_space<semaphore_mem>>
      tpu.wait_dma2 semaphore(%110 : memref<!tpu.dma_semaphore, #tpu.memory_space<semaphore_mem>>) src(%107 : memref<1x32xf32, #tpu.memory_space<any>>) dst(%108 : memref<1x32xf32, #tpu.memory_space<vmem>>)
      %c3_i32_99 = arith.constant 3 : i32
      %c0_i32_100 = arith.constant 0 : i32
      %111 = tpu.memref_slice %arg4[%35, %c0_i32_100] : memref<128x32xf32, #tpu.memory_space<any>> -> memref<1x32xf32, #tpu.memory_space<any>>
      %c3_i32_101 = arith.constant 3 : i32
      %c0_i32_102 = arith.constant 0 : i32
      %112 = tpu.memref_slice %arg13[%c3_i32_101, %c0_i32_102] : memref<8x32xf32, #tpu.memory_space<vmem>> -> memref<1x32xf32, #tpu.memory_space<vmem>>
      %113 = tpu.memref_slice %arg17[%c3_i32_99] : memref<8x!tpu.dma_semaphore, #tpu.memory_space<semaphore_mem>> -> memref<1x!tpu.dma_semaphore, #tpu.memory_space<semaphore_mem>>
      %114 = tpu.memref_squeeze %113 : memref<1x!tpu.dma_semaphore, #tpu.memory_space<semaphore_mem>> -> memref<!tpu.dma_semaphore, #tpu.memory_space<semaphore_mem>>
      tpu.wait_dma2 semaphore(%114 : memref<!tpu.dma_semaphore, #tpu.memory_space<semaphore_mem>>) src(%111 : memref<1x32xf32, #tpu.memory_space<any>>) dst(%112 : memref<1x32xf32, #tpu.memory_space<vmem>>)
      %c4_i32_103 = arith.constant 4 : i32
      %c0_i32_104 = arith.constant 0 : i32
      %115 = tpu.memref_slice %arg4[%40, %c0_i32_104] : memref<128x32xf32, #tpu.memory_space<any>> -> memref<1x32xf32, #tpu.memory_space<any>>
      %c4_i32_105 = arith.constant 4 : i32
      %c0_i32_106 = arith.constant 0 : i32
      %116 = tpu.memref_slice %arg13[%c4_i32_105, %c0_i32_106] : memref<8x32xf32, #tpu.memory_space<vmem>> -> memref<1x32xf32, #tpu.memory_space<vmem>>
      %117 = tpu.memref_slice %arg17[%c4_i32_103] : memref<8x!tpu.dma_semaphore, #tpu.memory_space<semaphore_mem>> -> memref<1x!tpu.dma_semaphore, #tpu.memory_space<semaphore_mem>>
      %118 = tpu.memref_squeeze %117 : memref<1x!tpu.dma_semaphore, #tpu.memory_space<semaphore_mem>> -> memref<!tpu.dma_semaphore, #tpu.memory_space<semaphore_mem>>
      tpu.wait_dma2 semaphore(%118 : memref<!tpu.dma_semaphore, #tpu.memory_space<semaphore_mem>>) src(%115 : memref<1x32xf32, #tpu.memory_space<any>>) dst(%116 : memref<1x32xf32, #tpu.memory_space<vmem>>)
      %c5_i32_107 = arith.constant 5 : i32
      %c0_i32_108 = arith.constant 0 : i32
      %119 = tpu.memref_slice %arg4[%45, %c0_i32_108] : memref<128x32xf32, #tpu.memory_space<any>> -> memref<1x32xf32, #tpu.memory_space<any>>
      %c5_i32_109 = arith.constant 5 : i32
      %c0_i32_110 = arith.constant 0 : i32
      %120 = tpu.memref_slice %arg13[%c5_i32_109, %c0_i32_110] : memref<8x32xf32, #tpu.memory_space<vmem>> -> memref<1x32xf32, #tpu.memory_space<vmem>>
      %121 = tpu.memref_slice %arg17[%c5_i32_107] : memref<8x!tpu.dma_semaphore, #tpu.memory_space<semaphore_mem>> -> memref<1x!tpu.dma_semaphore, #tpu.memory_space<semaphore_mem>>
      %122 = tpu.memref_squeeze %121 : memref<1x!tpu.dma_semaphore, #tpu.memory_space<semaphore_mem>> -> memref<!tpu.dma_semaphore, #tpu.memory_space<semaphore_mem>>
      tpu.wait_dma2 semaphore(%122 : memref<!tpu.dma_semaphore, #tpu.memory_space<semaphore_mem>>) src(%119 : memref<1x32xf32, #tpu.memory_space<any>>) dst(%120 : memref<1x32xf32, #tpu.memory_space<vmem>>)
      %c6_i32_111 = arith.constant 6 : i32
      %c0_i32_112 = arith.constant 0 : i32
      %123 = tpu.memref_slice %arg4[%50, %c0_i32_112] : memref<128x32xf32, #tpu.memory_space<any>> -> memref<1x32xf32, #tpu.memory_space<any>>
      %c6_i32_113 = arith.constant 6 : i32
      %c0_i32_114 = arith.constant 0 : i32
      %124 = tpu.memref_slice %arg13[%c6_i32_113, %c0_i32_114] : memref<8x32xf32, #tpu.memory_space<vmem>> -> memref<1x32xf32, #tpu.memory_space<vmem>>
      %125 = tpu.memref_slice %arg17[%c6_i32_111] : memref<8x!tpu.dma_semaphore, #tpu.memory_space<semaphore_mem>> -> memref<1x!tpu.dma_semaphore, #tpu.memory_space<semaphore_mem>>
      %126 = tpu.memref_squeeze %125 : memref<1x!tpu.dma_semaphore, #tpu.memory_space<semaphore_mem>> -> memref<!tpu.dma_semaphore, #tpu.memory_space<semaphore_mem>>
      tpu.wait_dma2 semaphore(%126 : memref<!tpu.dma_semaphore, #tpu.memory_space<semaphore_mem>>) src(%123 : memref<1x32xf32, #tpu.memory_space<any>>) dst(%124 : memref<1x32xf32, #tpu.memory_space<vmem>>)
      %c7_i32_115 = arith.constant 7 : i32
      %c0_i32_116 = arith.constant 0 : i32
      %127 = tpu.memref_slice %arg4[%55, %c0_i32_116] : memref<128x32xf32, #tpu.memory_space<any>> -> memref<1x32xf32, #tpu.memory_space<any>>
      %c7_i32_117 = arith.constant 7 : i32
      %c0_i32_118 = arith.constant 0 : i32
      %128 = tpu.memref_slice %arg13[%c7_i32_117, %c0_i32_118] : memref<8x32xf32, #tpu.memory_space<vmem>> -> memref<1x32xf32, #tpu.memory_space<vmem>>
      %129 = tpu.memref_slice %arg17[%c7_i32_115] : memref<8x!tpu.dma_semaphore, #tpu.memory_space<semaphore_mem>> -> memref<1x!tpu.dma_semaphore, #tpu.memory_space<semaphore_mem>>
      %130 = tpu.memref_squeeze %129 : memref<1x!tpu.dma_semaphore, #tpu.memory_space<semaphore_mem>> -> memref<!tpu.dma_semaphore, #tpu.memory_space<semaphore_mem>>
      tpu.wait_dma2 semaphore(%130 : memref<!tpu.dma_semaphore, #tpu.memory_space<semaphore_mem>>) src(%127 : memref<1x32xf32, #tpu.memory_space<any>>) dst(%128 : memref<1x32xf32, #tpu.memory_space<vmem>>)
      %c0_119 = arith.constant 0 : index
      %c0_120 = arith.constant 0 : index
      %131 = vector.load %arg13[%c0_119, %c0_120] : memref<8x32xf32, #tpu.memory_space<vmem>>, vector<8x32xf32>
      %132 = arith.truncf %131 : vector<8x32xf32> to vector<8x32xbf16>
      %c0_121 = arith.constant 0 : index
      %c0_122 = arith.constant 0 : index
      %c0_123 = arith.constant 0 : index
      %133 = vector.load %arg5[%c0_121, %c0_122, %c0_123] : memref<3x32x64xbf16, #tpu.memory_space<vmem>>, vector<1x32x64xbf16>
      %134 = vector.shape_cast %133 : vector<1x32x64xbf16> to vector<32x64xbf16>
      %cst_124 = arith.constant dense<0.000000e+00> : vector<8x64xf32>
      %135 = tpu.matmul %132, %134, %cst_124 {dimension_numbers = #tpu.dot_dimension_numbers<[1], [0], [0], [1], [0, 0, 1, 1], [], []>} : vector<8x32xbf16>, vector<32x64xbf16>, vector<8x64xf32> -> vector<8x64xf32>
      %136 = arith.addf %135, %84 : vector<8x64xf32>
      %c1_125 = arith.constant 1 : index
      %c0_126 = arith.constant 0 : index
      %c0_127 = arith.constant 0 : index
      %137 = vector.load %arg5[%c1_125, %c0_126, %c0_127] : memref<3x32x64xbf16, #tpu.memory_space<vmem>>, vector<1x32x64xbf16>
      %138 = vector.shape_cast %137 : vector<1x32x64xbf16> to vector<32x64xbf16>
      %cst_128 = arith.constant dense<0.000000e+00> : vector<8x64xf32>
      %139 = tpu.matmul %132, %138, %cst_128 {dimension_numbers = #tpu.dot_dimension_numbers<[1], [0], [0], [1], [0, 0, 1, 1], [], []>} : vector<8x32xbf16>, vector<32x64xbf16>, vector<8x64xf32> -> vector<8x64xf32>
      %140 = arith.addf %139, %91 : vector<8x64xf32>
      %c2_129 = arith.constant 2 : index
      %c0_130 = arith.constant 0 : index
      %c0_131 = arith.constant 0 : index
      %141 = vector.load %arg5[%c2_129, %c0_130, %c0_131] : memref<3x32x64xbf16, #tpu.memory_space<vmem>>, vector<1x32x64xbf16>
      %142 = vector.shape_cast %141 : vector<1x32x64xbf16> to vector<32x64xbf16>
      %cst_132 = arith.constant dense<0.000000e+00> : vector<8x64xf32>
      %143 = tpu.matmul %132, %142, %cst_132 {dimension_numbers = #tpu.dot_dimension_numbers<[1], [0], [0], [1], [0, 0, 1, 1], [], []>} : vector<8x32xbf16>, vector<32x64xbf16>, vector<8x64xf32> -> vector<8x64xf32>
      %144 = arith.addf %143, %98 : vector<8x64xf32>
      %145 = arith.addf %136, %67 : vector<8x64xf32>
      %146 = arith.negf %145 : vector<8x64xf32>
      %147 = math.exp %146 : vector<8x64xf32>
      %cst_133 = arith.constant 1.000000e+00 : f32
      %148 = vector.broadcast %cst_133 : f32 to vector<8x64xf32>
      %149 = arith.addf %148, %147 : vector<8x64xf32>
      %150 = arith.divf %148, %149 : vector<8x64xf32>
      %151 = arith.addf %140, %70 : vector<8x64xf32>
      %152 = arith.negf %151 : vector<8x64xf32>
      %153 = math.exp %152 : vector<8x64xf32>
      %cst_134 = arith.constant 1.000000e+00 : f32
      %154 = vector.broadcast %cst_134 : f32 to vector<8x64xf32>
      %155 = arith.addf %154, %153 : vector<8x64xf32>
      %156 = arith.divf %154, %155 : vector<8x64xf32>
      %157 = arith.mulf %150, %77 : vector<8x64xf32>
      %158 = arith.addf %144, %157 : vector<8x64xf32>
      %159 = math.tanh %158 : vector<8x64xf32>
      %cst_135 = arith.constant 1.000000e+00 : f32
      %160 = vector.broadcast %cst_135 : f32 to vector<8x64xf32>
      %161 = arith.subf %160, %156 : vector<8x64xf32>
      %162 = arith.mulf %161, %159 : vector<8x64xf32>
      %163 = arith.mulf %156, %63 : vector<8x64xf32>
      %164 = arith.addf %162, %163 : vector<8x64xf32>
      %c1_136 = arith.constant 1 : index
      %c0_137 = arith.constant 0 : index
      %c0_138 = arith.constant 0 : index
      %165 = vector.load %arg2[%c1_136, %c0_137, %c0_138] : memref<2x8x64xf32, #tpu.memory_space<vmem>>, vector<1x8x64xf32>
      %166 = vector.shape_cast %165 : vector<1x8x64xf32> to vector<8x64xf32>
      %167 = arith.truncf %166 : vector<8x64xf32> to vector<8x64xbf16>
      %168 = arith.truncf %164 : vector<8x64xf32> to vector<8x64xbf16>
      %c6_139 = arith.constant 6 : index
      %c0_140 = arith.constant 0 : index
      %c0_141 = arith.constant 0 : index
      %169 = vector.load %arg6[%c6_139, %c0_140, %c0_141] : memref<12x64x64xbf16, #tpu.memory_space<vmem>>, vector<1x64x64xbf16>
      %170 = vector.shape_cast %169 : vector<1x64x64xbf16> to vector<64x64xbf16>
      %cst_142 = arith.constant dense<0.000000e+00> : vector<8x64xf32>
      %171 = tpu.matmul %168, %170, %cst_142 {dimension_numbers = #tpu.dot_dimension_numbers<[1], [0], [0], [1], [0, 0, 1, 1], [], []>} : vector<8x64xbf16>, vector<64x64xbf16>, vector<8x64xf32> -> vector<8x64xf32>
      %c4_143 = arith.constant 4 : index
      %c0_144 = arith.constant 0 : index
      %c0_145 = arith.constant 0 : index
      %172 = vector.load %arg7[%c4_143, %c0_144, %c0_145] : memref<8x1x64xf32, #tpu.memory_space<vmem>>, vector<1x1x64xf32>
      %173 = vector.shape_cast %172 : vector<1x1x64xf32> to vector<1x64xf32>
      %174 = vector.broadcast %173 : vector<1x64xf32> to vector<8x64xf32>
      %175 = arith.addf %171, %174 : vector<8x64xf32>
      %c7_146 = arith.constant 7 : index
      %c0_147 = arith.constant 0 : index
      %c0_148 = arith.constant 0 : index
      %176 = vector.load %arg6[%c7_146, %c0_147, %c0_148] : memref<12x64x64xbf16, #tpu.memory_space<vmem>>, vector<1x64x64xbf16>
      %177 = vector.shape_cast %176 : vector<1x64x64xbf16> to vector<64x64xbf16>
      %cst_149 = arith.constant dense<0.000000e+00> : vector<8x64xf32>
      %178 = tpu.matmul %168, %177, %cst_149 {dimension_numbers = #tpu.dot_dimension_numbers<[1], [0], [0], [1], [0, 0, 1, 1], [], []>} : vector<8x64xbf16>, vector<64x64xbf16>, vector<8x64xf32> -> vector<8x64xf32>
      %c5_150 = arith.constant 5 : index
      %c0_151 = arith.constant 0 : index
      %c0_152 = arith.constant 0 : index
      %179 = vector.load %arg7[%c5_150, %c0_151, %c0_152] : memref<8x1x64xf32, #tpu.memory_space<vmem>>, vector<1x1x64xf32>
      %180 = vector.shape_cast %179 : vector<1x1x64xf32> to vector<1x64xf32>
      %181 = vector.broadcast %180 : vector<1x64xf32> to vector<8x64xf32>
      %182 = arith.addf %178, %181 : vector<8x64xf32>
      %c8 = arith.constant 8 : index
      %c0_153 = arith.constant 0 : index
      %c0_154 = arith.constant 0 : index
      %183 = vector.load %arg6[%c8, %c0_153, %c0_154] : memref<12x64x64xbf16, #tpu.memory_space<vmem>>, vector<1x64x64xbf16>
      %184 = vector.shape_cast %183 : vector<1x64x64xbf16> to vector<64x64xbf16>
      %cst_155 = arith.constant dense<0.000000e+00> : vector<8x64xf32>
      %185 = tpu.matmul %168, %184, %cst_155 {dimension_numbers = #tpu.dot_dimension_numbers<[1], [0], [0], [1], [0, 0, 1, 1], [], []>} : vector<8x64xbf16>, vector<64x64xbf16>, vector<8x64xf32> -> vector<8x64xf32>
      %c6_156 = arith.constant 6 : index
      %c0_157 = arith.constant 0 : index
      %c0_158 = arith.constant 0 : index
      %186 = vector.load %arg7[%c6_156, %c0_157, %c0_158] : memref<8x1x64xf32, #tpu.memory_space<vmem>>, vector<1x1x64xf32>
      %187 = vector.shape_cast %186 : vector<1x1x64xf32> to vector<1x64xf32>
      %188 = vector.broadcast %187 : vector<1x64xf32> to vector<8x64xf32>
      %189 = arith.addf %185, %188 : vector<8x64xf32>
      %c9 = arith.constant 9 : index
      %c0_159 = arith.constant 0 : index
      %c0_160 = arith.constant 0 : index
      %190 = vector.load %arg6[%c9, %c0_159, %c0_160] : memref<12x64x64xbf16, #tpu.memory_space<vmem>>, vector<1x64x64xbf16>
      %191 = vector.shape_cast %190 : vector<1x64x64xbf16> to vector<64x64xbf16>
      %cst_161 = arith.constant dense<0.000000e+00> : vector<8x64xf32>
      %192 = tpu.matmul %167, %191, %cst_161 {dimension_numbers = #tpu.dot_dimension_numbers<[1], [0], [0], [1], [0, 0, 1, 1], [], []>} : vector<8x64xbf16>, vector<64x64xbf16>, vector<8x64xf32> -> vector<8x64xf32>
      %c10 = arith.constant 10 : index
      %c0_162 = arith.constant 0 : index
      %c0_163 = arith.constant 0 : index
      %193 = vector.load %arg6[%c10, %c0_162, %c0_163] : memref<12x64x64xbf16, #tpu.memory_space<vmem>>, vector<1x64x64xbf16>
      %194 = vector.shape_cast %193 : vector<1x64x64xbf16> to vector<64x64xbf16>
      %cst_164 = arith.constant dense<0.000000e+00> : vector<8x64xf32>
      %195 = tpu.matmul %167, %194, %cst_164 {dimension_numbers = #tpu.dot_dimension_numbers<[1], [0], [0], [1], [0, 0, 1, 1], [], []>} : vector<8x64xbf16>, vector<64x64xbf16>, vector<8x64xf32> -> vector<8x64xf32>
      %c11 = arith.constant 11 : index
      %c0_165 = arith.constant 0 : index
      %c0_166 = arith.constant 0 : index
      %196 = vector.load %arg6[%c11, %c0_165, %c0_166] : memref<12x64x64xbf16, #tpu.memory_space<vmem>>, vector<1x64x64xbf16>
      %197 = vector.shape_cast %196 : vector<1x64x64xbf16> to vector<64x64xbf16>
      %cst_167 = arith.constant dense<0.000000e+00> : vector<8x64xf32>
      %198 = tpu.matmul %167, %197, %cst_167 {dimension_numbers = #tpu.dot_dimension_numbers<[1], [0], [0], [1], [0, 0, 1, 1], [], []>} : vector<8x64xbf16>, vector<64x64xbf16>, vector<8x64xf32> -> vector<8x64xf32>
      %c7_168 = arith.constant 7 : index
      %c0_169 = arith.constant 0 : index
      %c0_170 = arith.constant 0 : index
      %199 = vector.load %arg7[%c7_168, %c0_169, %c0_170] : memref<8x1x64xf32, #tpu.memory_space<vmem>>, vector<1x1x64xf32>
      %200 = vector.shape_cast %199 : vector<1x1x64xf32> to vector<1x64xf32>
      %201 = vector.broadcast %200 : vector<1x64xf32> to vector<8x64xf32>
      %202 = arith.addf %198, %201 : vector<8x64xf32>
      %203 = arith.addf %175, %192 : vector<8x64xf32>
      %204 = arith.negf %203 : vector<8x64xf32>
      %205 = math.exp %204 : vector<8x64xf32>
      %cst_171 = arith.constant 1.000000e+00 : f32
      %206 = vector.broadcast %cst_171 : f32 to vector<8x64xf32>
      %207 = arith.addf %206, %205 : vector<8x64xf32>
      %208 = arith.divf %206, %207 : vector<8x64xf32>
      %209 = arith.addf %182, %195 : vector<8x64xf32>
      %210 = arith.negf %209 : vector<8x64xf32>
      %211 = math.exp %210 : vector<8x64xf32>
      %cst_172 = arith.constant 1.000000e+00 : f32
      %212 = vector.broadcast %cst_172 : f32 to vector<8x64xf32>
      %213 = arith.addf %212, %211 : vector<8x64xf32>
      %214 = arith.divf %212, %213 : vector<8x64xf32>
      %215 = arith.mulf %208, %202 : vector<8x64xf32>
      %216 = arith.addf %189, %215 : vector<8x64xf32>
      %217 = math.tanh %216 : vector<8x64xf32>
      %cst_173 = arith.constant 1.000000e+00 : f32
      %218 = vector.broadcast %cst_173 : f32 to vector<8x64xf32>
      %219 = arith.subf %218, %214 : vector<8x64xf32>
      %220 = arith.mulf %219, %217 : vector<8x64xf32>
      %221 = arith.mulf %214, %166 : vector<8x64xf32>
      %222 = arith.addf %220, %221 : vector<8x64xf32>
      %c0_174 = arith.constant 0 : index
      %c0_175 = arith.constant 0 : index
      %c0_176 = arith.constant 0 : index
      %223 = vector.load %arg12[%c0_174, %c0_175, %c0_176] : memref<2x8x64xf32, #tpu.memory_space<vmem>>, vector<1x8x64xf32>
      %224 = vector.shape_cast %223 : vector<1x8x64xf32> to vector<8x64xf32>
      %225 = vector.shape_cast %164 : vector<8x64xf32> to vector<1x8x64xf32>
      tpu.vector_store %arg12[%c0_174, %c0_175, %c0_176], %225 {strides = array<i32>} : memref<2x8x64xf32, #tpu.memory_space<vmem>>, vector<1x8x64xf32>,
      %c1_177 = arith.constant 1 : index
      %c0_178 = arith.constant 0 : index
      %c0_179 = arith.constant 0 : index
      %226 = vector.load %arg12[%c1_177, %c0_178, %c0_179] : memref<2x8x64xf32, #tpu.memory_space<vmem>>, vector<1x8x64xf32>
      %227 = vector.shape_cast %226 : vector<1x8x64xf32> to vector<8x64xf32>
      %228 = vector.shape_cast %222 : vector<8x64xf32> to vector<1x8x64xf32>
      tpu.vector_store %arg12[%c1_177, %c0_178, %c0_179], %228 {strides = array<i32>} : memref<2x8x64xf32, #tpu.memory_space<vmem>>, vector<1x8x64xf32>,
      %c0_180 = arith.constant 0 : index
      %c0_181 = arith.constant 0 : index
      %229 = vector.load %arg14[%c0_180, %c0_181] : memref<8x32xbf16, #tpu.memory_space<vmem>>, vector<8x32xbf16>
      tpu.vector_store %arg14[%c0_180, %c0_181], %132 {strides = array<i32>} : memref<8x32xbf16, #tpu.memory_space<vmem>>, vector<8x32xbf16>,
      %c0_182 = arith.constant 0 : index
      %c0_183 = arith.constant 0 : index
      %230 = vector.load %arg15[%c0_182, %c0_183] : memref<8x64xbf16, #tpu.memory_space<vmem>>, vector<8x64xbf16>
      tpu.vector_store %arg15[%c0_182, %c0_183], %61 {strides = array<i32>} : memref<8x64xbf16, #tpu.memory_space<vmem>>, vector<8x64xbf16>,
      %231 = arith.truncf %222 : vector<8x64xf32> to vector<8x64xbf16>
      %c0_184 = arith.constant 0 : index
      %c0_185 = arith.constant 0 : index
      %232 = vector.load %arg16[%c0_184, %c0_185] : memref<8x64xbf16, #tpu.memory_space<vmem>>, vector<8x64xbf16>
      tpu.vector_store %arg16[%c0_184, %c0_185], %231 {strides = array<i32>} : memref<8x64xbf16, #tpu.memory_space<vmem>>, vector<8x64xbf16>,
    } else {
    }
    %c0 = arith.constant 0 : index
    %c0_1 = arith.constant 0 : index
    %3 = vector.load %arg16[%c0, %c0_1] : memref<8x64xbf16, #tpu.memory_space<vmem>>, vector<8x64xbf16>
    %c0_2 = arith.constant 0 : index
    %c0_3 = arith.constant 0 : index
    %c0_4 = arith.constant 0 : index
    %4 = vector.load %arg8[%c0_2, %c0_3, %c0_4] : memref<2x64x128xbf16, #tpu.memory_space<vmem>>, vector<1x64x128xbf16>
    %5 = vector.shape_cast %4 : vector<1x64x128xbf16> to vector<64x128xbf16>
    %cst = arith.constant dense<0.000000e+00> : vector<8x128xf32>
    %6 = tpu.matmul %3, %5, %cst {dimension_numbers = #tpu.dot_dimension_numbers<[1], [0], [0], [1], [0, 0, 1, 1], [], []>} : vector<8x64xbf16>, vector<64x128xbf16>, vector<8x128xf32> -> vector<8x128xf32>
    %c0_5 = arith.constant 0 : index
    %c0_6 = arith.constant 0 : index
    %7 = vector.load %arg14[%c0_5, %c0_6] : memref<8x32xbf16, #tpu.memory_space<vmem>>, vector<8x32xbf16>
    %c0_7 = arith.constant 0 : index
    %c0_8 = arith.constant 0 : index
    %8 = vector.load %arg9[%c0_7, %c0_8] : memref<32x128xbf16, #tpu.memory_space<vmem>>, vector<32x128xbf16>
    %cst_9 = arith.constant dense<0.000000e+00> : vector<8x128xf32>
    %9 = tpu.matmul %7, %8, %cst_9 {dimension_numbers = #tpu.dot_dimension_numbers<[1], [0], [0], [1], [0, 0, 1, 1], [], []>} : vector<8x32xbf16>, vector<32x128xbf16>, vector<8x128xf32> -> vector<8x128xf32>
    %10 = arith.addf %6, %9 : vector<8x128xf32>
    %c0_10 = arith.constant 0 : index
    %c0_11 = arith.constant 0 : index
    %11 = vector.load %arg15[%c0_10, %c0_11] : memref<8x64xbf16, #tpu.memory_space<vmem>>, vector<8x64xbf16>
    %c1 = arith.constant 1 : index
    %c0_12 = arith.constant 0 : index
    %c0_13 = arith.constant 0 : index
    %12 = vector.load %arg8[%c1, %c0_12, %c0_13] : memref<2x64x128xbf16, #tpu.memory_space<vmem>>, vector<1x64x128xbf16>
    %13 = vector.shape_cast %12 : vector<1x64x128xbf16> to vector<64x128xbf16>
    %cst_14 = arith.constant dense<0.000000e+00> : vector<8x128xf32>
    %14 = tpu.matmul %11, %13, %cst_14 {dimension_numbers = #tpu.dot_dimension_numbers<[1], [0], [0], [1], [0, 0, 1, 1], [], []>} : vector<8x64xbf16>, vector<64x128xbf16>, vector<8x128xf32> -> vector<8x128xf32>
    %15 = arith.addf %10, %14 : vector<8x128xf32>
    %c0_15 = arith.constant 0 : index
    %c0_16 = arith.constant 0 : index
    %16 = vector.load %arg10[%c0_15, %c0_16] : memref<1x128xf32, #tpu.memory_space<vmem>>, vector<1x128xf32>
    %17 = vector.broadcast %16 : vector<1x128xf32> to vector<8x128xf32>
    %18 = arith.addf %15, %17 : vector<8x128xf32>
    %c0_17 = arith.constant 0 : index
    %c0_18 = arith.constant 0 : index
    %19 = vector.load %arg11[%c0_17, %c0_18] : memref<8x128xf32, #tpu.memory_space<vmem>>, vector<8x128xf32>
    tpu.vector_store %arg11[%c0_17, %c0_18], %18 {strides = array<i32>} : memref<8x128xf32, #tpu.memory_space<vmem>>, vector<8x128xf32>,
    return
  }
  func.func @transform_0(%arg0: i32, %arg1: memref<8xi32, #tpu.memory_space<smem>>) -> (i32, i32, i32) {
    %c0_i32 = arith.constant 0 : i32
    %c0_i32_0 = arith.constant 0 : i32
    %c0_i32_1 = arith.constant 0 : i32
    %c0_i32_2 = arith.constant 0 : i32
    return %c0_i32, %c0_i32_0, %c0_i32_1 : i32, i32, i32
  }
  func.func @transform_1(%arg0: i32, %arg1: memref<8xi32, #tpu.memory_space<smem>>) -> (i32, i32) {
    %c0_i32 = arith.constant 0 : i32
    %c0_i32_0 = arith.constant 0 : i32
    %c0_i32_1 = arith.constant 0 : i32
    return %c0_i32, %c0_i32_0 : i32, i32
  }
  func.func @transform_3(%arg0: i32, %arg1: memref<8xi32, #tpu.memory_space<smem>>) -> (i32, i32, i32) {
    %c0_i32 = arith.constant 0 : i32
    %c0_i32_0 = arith.constant 0 : i32
    %c0_i32_1 = arith.constant 0 : i32
    %c0_i32_2 = arith.constant 0 : i32
    return %c0_i32, %c0_i32_0, %c0_i32_1 : i32, i32, i32
  }
  func.func @transform_4(%arg0: i32, %arg1: memref<8xi32, #tpu.memory_space<smem>>) -> (i32, i32, i32) {
    %c0_i32 = arith.constant 0 : i32
    %c0_i32_0 = arith.constant 0 : i32
    %c0_i32_1 = arith.constant 0 : i32
    %c0_i32_2 = arith.constant 0 : i32
    return %c0_i32, %c0_i32_0, %c0_i32_1 : i32, i32, i32
  }
  func.func @transform_5(%arg0: i32, %arg1: memref<8xi32, #tpu.memory_space<smem>>) -> (i32, i32, i32) {
    %c0_i32 = arith.constant 0 : i32
    %c0_i32_0 = arith.constant 0 : i32
    %c0_i32_1 = arith.constant 0 : i32
    %c0_i32_2 = arith.constant 0 : i32
    return %c0_i32, %c0_i32_0, %c0_i32_1 : i32, i32, i32
  }
  func.func @transform_6(%arg0: i32, %arg1: memref<8xi32, #tpu.memory_space<smem>>) -> (i32, i32, i32) {
    %c0_i32 = arith.constant 0 : i32
    %c0_i32_0 = arith.constant 0 : i32
    %c0_i32_1 = arith.constant 0 : i32
    return %c0_i32, %c0_i32_0, %arg0 : i32, i32, i32
  }
  func.func @transform_7(%arg0: i32, %arg1: memref<8xi32, #tpu.memory_space<smem>>) -> (i32, i32) {
    %c0_i32 = arith.constant 0 : i32
    %c0_i32_0 = arith.constant 0 : i32
    return %c0_i32, %arg0 : i32, i32
  }
  func.func @transform_8(%arg0: i32, %arg1: memref<8xi32, #tpu.memory_space<smem>>) -> (i32, i32) {
    %c0_i32 = arith.constant 0 : i32
    %c0_i32_0 = arith.constant 0 : i32
    return %c0_i32, %arg0 : i32, i32
  }
  func.func @transform_9(%arg0: i32, %arg1: memref<8xi32, #tpu.memory_space<smem>>) -> (i32, i32) {
    %c0_i32 = arith.constant 0 : i32
    %c0_i32_0 = arith.constant 0 : i32
    return %c0_i32, %arg0 : i32, i32
  }
  func.func @transform_10(%arg0: i32, %arg1: memref<8xi32, #tpu.memory_space<smem>>) -> (i32, i32, i32) {
    %c0_i32 = arith.constant 0 : i32
    %c0_i32_0 = arith.constant 0 : i32
    %c0_i32_1 = arith.constant 0 : i32
    %c0_i32_2 = arith.constant 0 : i32
    return %c0_i32, %c0_i32_0, %c0_i32_1 : i32, i32, i32
  }
}

</mosaic_0001>

<bundles_post_ra>
// kernel: tpu_custom_call.1
= control target key start
LH: loop header
LB: loop body
LE: loop exit
PB: predicated region body
PF: predicated region fallthrough
CT: control target
= control target key end

     0   :  { %s2032_s20 = smov [#allocation8]   ;;  %s2285_s0 = inlined_call_operand.vmem [shape: s32[8], index: 0, kind: input, shape index: {}]   ;;  %s2286_s1 = inlined_call_operand.hbm [shape: f32[2,8,64], index: 1, kind: input, shape index: {}, may-alias: {1,11}]   ;;  %s2287_s2 = inlined_call_operand.vmem [shape: f32[8,64], index: 2, kind: input, shape index: {}]   ;;  %s2288_s3 = inlined_call_operand.vmem [shape: f32[128,32], index: 3, kind: input, shape index: {}]   ;;  %s2289_s4 = inlined_call_operand.vmem [shape: bf16[3,32,64], index: 4, kind: input, shape index: {}]   ;;  %s2290_s5 = inlined_call_operand.hbm [shape: bf16[12,64,64], index: 5, kind: input, shape index: {}]   ;;  %s2291_s6 = inlined_call_operand.vmem [shape: f32[8,1,64], index: 6, kind: input, shape index: {}]   ;;  %s2292_s7 = inlined_call_operand.vmem [shape: bf16[2,64,128], index: 7, kind: input, shape index: {}]   ;;  %s2293_s8 = inlined_call_operand.vmem [shape: bf16[32,128], index: 8, kind: input, shape index: {}]   ;;  %s2294_s9 = inlined_call_operand.vmem [shape: f32[1,128], index: 9, kind: input, shape index: {}]   ;;  %s2295_s10 = inlined_call_operand.hbm [shape: f32[8,128], index: 10, kind: output, shape index: {0}]   ;;  %s2296_s11 = inlined_call_operand.hbm [shape: f32[2,8,64], index: 11, kind: output, shape index: {1}, may-alias: {1,11}]  }
   0x1   :  { %s18_s19 = sshll.u32 %s2285_s0, 4  ;;  %s19_s19 = int_to_ptr.vmem [resolvable:$true] %s18_s19 }
   0x2   :  { %21 = dma.vmem_to_smem %s19_s19, 16, %s2032_s20, [#allocation7] }
   0x3   :  { %2006 = dma.done.wait [#allocation7], 16 }
   0x4   :  { %2007 = vsyncadd [#allocation7], 4294967280 }
   0x5   :  { %24 = sfence }
   0x6   :  { %25 = vsyncpa [#allocation10], 0 }
   0x7   :  { %26 = vsyncpa [#allocation13], 0 }
   0x8   :  { %27 = vsyncpa [#allocation11], 0 }
   0x9   :  { %28 = vsyncpa [#allocation16], 0  ;;  %s33_s23 = sshll.u32 %s2286_s1, 4  ;;  %s2033_s24 = smov [#allocation9]   ;;  %s34_s23 = int_to_ptr.hbm [resolvable:$true] %s33_s23 }
   0xa   :  { %s35_s25 = sshll.u32 %s2033_s24, 4  ;;  %s50_s27 = sshll.u32 %s2290_s5, 4  ;;  %s36_s25 = int_to_ptr.vmem [resolvable:$true] %s35_s25  ;;  %s51_s27 = int_to_ptr.hbm [resolvable:$true] %s50_s27 }
   0xb   :  { %s2034_s28 = smov 128   ;;  %s2035_s29 = smov 8  }
   0xc   :  { %41 = dma.hbm_to_vmem [thread:$0]  %s34_s23, 256, %s36_s25, [#allocation10], %s2034_s28, %s2034_s28, %s2035_s29  }
   0xd   :  { %s2036_s30 = smov [#allocation12]   ;;  %s2037_s13 = smov 64  }
   0xe   :  { %s52_s12 = sshll.u32 %s2036_s30, 4  ;;  %s2038_s1 = smov 4   ;;  %s53_s12 = int_to_ptr.vmem [resolvable:$true] %s52_s12 }
   0xf   :  { %58 = dma.hbm_to_vmem [thread:$0]  %s51_s27, 6144, %s53_s12, [#allocation13], %s2037_s13, %s2037_s13, %s2038_s1  }
  0x10   :  { %2008 = dma.done.wait [#allocation10], 256  }
  0x11   :  { %2009 = vsyncadd [#allocation10], 4294967040 }
  0x12   :  { %2010 = dma.done.wait [#allocation13], 6144  }
  0x13   :  { %2011 = vsyncadd [#allocation13], 4294961152  ;;  %s80_s14 = sld [smem:[#allocation8]] }
  0x19   :  { %s81_s16 = scalar_lea.vmem %s2288_s3, %s80_s14 }
  0x1a   :  { %v96_v0 = vld [vmem:[%s81_s16] sm:$0x1] }
  0x1b   :  { %97 = vst [vmem:[#allocation2] sm:$0x1] %v96_v0 }
  0x1c   :  { %115 = vsyncadd [#allocation6], 16  ;;  %s1480_s17 = sld [smem:[#allocation8 + $0x1]] }
  0x22   :  { %s117_s20 = scalar_lea.vmem %s2288_s3, %s1480_s17 }
  0x23   :  { %v134_v1 = vld [vmem:[%s117_s20] sm:$0x1] }
  0x24   :  { %135 = vst [vmem:[#allocation2 + $0x1] sm:$0x1] %v134_v1 }
  0x25   :  { %153 = vsyncadd [#allocation6 + $0x1], 16  ;;  %s1481_s21 = sld [smem:[#allocation8 + $0x2]] }
  0x2b   :  { %s155_s24 = scalar_lea.vmem %s2288_s3, %s1481_s21 }
  0x2c   :  { %v172_v2 = vld [vmem:[%s155_s24] sm:$0x1] }
  0x2d   :  { %173 = vst [vmem:[#allocation2 + $0x2] sm:$0x1] %v172_v2 }
  0x2e   :  { %191 = vsyncadd [#allocation6 + $0x2], 16  ;;  %s1482_s25 = sld [smem:[#allocation8 + $0x3]] }
  0x34   :  { %s193_s27 = scalar_lea.vmem %s2288_s3, %s1482_s25 }
  0x35   :  { %v210_v3 = vld [vmem:[%s193_s27] sm:$0x1] }
  0x36   :  { %211 = vst [vmem:[#allocation2 + $0x3] sm:$0x1] %v210_v3 }
  0x37   :  { %229 = vsyncadd [#allocation6 + $0x3], 16  ;;  %s1483_s30 = sld [smem:[#allocation8 + $0x4]] }
  0x3d   :  { %s231_s1 = scalar_lea.vmem %s2288_s3, %s1483_s30 }
  0x3e   :  { %v248_v4 = vld [vmem:[%s231_s1] sm:$0x1] }
  0x3f   :  { %249 = vst [vmem:[#allocation2 + $0x4] sm:$0x1] %v248_v4 }
  0x40   :  { %267 = vsyncadd [#allocation6 + $0x4], 16  ;;  %s1484_s14 = sld [smem:[#allocation8 + $0x5]] }
  0x46   :  { %s269_s16 = scalar_lea.vmem %s2288_s3, %s1484_s14 }
  0x47   :  { %v286_v5 = vld [vmem:[%s269_s16] sm:$0x1] }
  0x48   :  { %287 = vst [vmem:[#allocation2 + $0x5] sm:$0x1] %v286_v5 }
  0x49   :  { %305 = vsyncadd [#allocation6 + $0x5], 16  ;;  %s1485_s17 = sld [smem:[#allocation8 + $0x6]] }
  0x4f   :  { %s307_s20 = scalar_lea.vmem %s2288_s3, %s1485_s17 }
  0x50   :  { %v324_v6 = vld [vmem:[%s307_s20] sm:$0x1] }
  0x51   :  { %325 = vst [vmem:[#allocation2 + $0x6] sm:$0x1] %v324_v6 }
  0x52   :  { %343 = vsyncadd [#allocation6 + $0x6], 16  ;;  %s1486_s21 = sld [smem:[#allocation8 + $0x7]] }
  0x58   :  { %s345_s24 = scalar_lea.vmem %s2288_s3, %s1486_s21 }
  0x59   :  { %v362_v7 = vld [vmem:[%s345_s24] sm:$0x1] }
  0x5a   :  { %363 = vst [vmem:[#allocation2 + $0x7] sm:$0x1] %v362_v7 }
  0x5b   :  { %381 = vsyncadd [#allocation6 + $0x7], 16  ;;  %v1799_v8 = vld [vmem:[#allocation12 + $0x78] sm:$0xff]  ;;  %v1798_v12 = vld [vmem:[#allocation12 + $0x70] sm:$0xff]  ;;  %vm419_vm0 = vcmask 523264  }
  0x5c   :  { %v1803_v9 = vld [vmem:[#allocation12 + $0x98] sm:$0xff]  ;;  %427 = vmatpush.bf16.msra.mxu0 %v1799_v8  ;;  %v1802_v13 = vld [vmem:[#allocation12 + $0x90] sm:$0xff]  ;;  %v1797_v16 = vld [vmem:[#allocation12 + $0x68] sm:$0xff] }
  0x5d   :  { %v1807_v10 = vld [vmem:[#allocation12 + $0xb8] sm:$0xff]  ;;  %473 = vmatpush.bf16.msra.mxu1 %v1803_v9  ;;  %v1806_v14 = vld [vmem:[#allocation12 + $0xb0] sm:$0xff]  ;;  %v1801_v17 = vld [vmem:[#allocation12 + $0x88] sm:$0xff] }
  0x5e   :  { %v1811_v11 = vld [vmem:[#allocation12 + $0x18] sm:$0xff]  ;;  %524 = vmatpush.bf16.msra.mxu2 %v1807_v10  ;;  %v1810_v15 = vld [vmem:[#allocation12 + $0x10] sm:$0xff]  ;;  %v1805_v18 = vld [vmem:[#allocation12 + $0xa8] sm:$0xff] }
  0x5f   :  { %576 = vmatpush.bf16.msra.mxu3 %v1811_v11  ;;  %v1809_v19 = vld [vmem:[#allocation12 + $0x8] sm:$0xff]  ;;  %v1796_v20 = vld [vmem:[#allocation12 + $0x60] sm:$0xff]  ;;  %v2137_v22 = vld [vmem:[#allocation9] sm:$0xff] }
  0x60   :  { %428 = vmatpush.bf16.msra.mxu0 %v1798_v12  ;;  %v1800_v21 = vld [vmem:[#allocation12 + $0x80] sm:$0xff]  ;;  %v1815_v26 = vld [vmem:[#allocation12 + $0x38] sm:$0xff]  ;;  %v385_v28 = vpack.c.bf16 %v2137_v22, %v2137_v22  ;;  %v1814_v30 = vld [vmem:[#allocation12 + $0x30] sm:$0xff] }
  0x61   :  { %474 = vmatpush.bf16.msra.mxu1 %v1802_v13  ;;  %v1804_v23 = vld [vmem:[#allocation12 + $0xa0] sm:$0xff]  ;;  %v1819_v27 = vld [vmem:[#allocation12 + $0x58] sm:$0xff]  ;;  %v1818_v31 = vld [vmem:[#allocation12 + $0x50] sm:$0xff] }
  0x62   :  { %525 = vmatpush.bf16.msra.mxu2 %v1806_v14  ;;  %v1808_v24 = vld [vmem:[#allocation12] sm:$0xff]  ;;  %v1813_v32 = vld [vmem:[#allocation12 + $0x28] sm:$0xff]  ;;  %v1869_v38 = vld [vmem:[%s2291_s6 + $0x3] ss:$0 sm:$0xff] }
  0x63   :  { %577 = vmatpush.bf16.msra.mxu3 %v1810_v15  ;;  %v382_v25 = vld [vmem:[%s2287_s2] sm:$0xff]  ;;  %v1817_v33 = vld [vmem:[#allocation12 + $0x48] sm:$0xff] }
  0x64   :  { %429 = vmatpush.bf16.msra.mxu0 %v1797_v16  ;;  %v2144_v29 = vpack.c.bf16 %v382_v25, %v382_v25  ;;  %v1812_v34 = vld [vmem:[#allocation12 + $0x20] sm:$0xff]  ;;  %v1870_v39 = vld [vmem:[%s2291_s6] ss:$0 sm:$0xff]  ;;  %v1871_v46 = vld [vmem:[%s2291_s6 + $0x1] ss:$0 sm:$0xff] }
  0x65   :  { %475 = vmatpush.bf16.msra.mxu1 %v1801_v17  ;;  %v1816_v35 = vld [vmem:[#allocation12 + $0x40] sm:$0xff]  ;;  %v1872_v47 = vld [vmem:[%s2291_s6 + $0x2] ss:$0 sm:$0xff] }
  0x66   :  { %526 = vmatpush.bf16.msra.mxu2 %v1805_v18 }
  0x67   :  { %578 = vmatpush.bf16.msra.mxu3 %v1809_v19 }
  0x68   :  { %430 = vmatpush.bf16.msra.mxu0 %v1796_v20 }
  0x69   :  { %476 = vmatpush.bf16.msra.mxu1 %v1800_v21 }
  0x6a   :  { %527 = vmatpush.bf16.msra.mxu2 %v1804_v23 }
  0x6b   :  { %579 = vmatpush.bf16.msra.mxu3 %v1808_v24  ;;  %1503 = vmatmul.msk.bf16.vlgmr.msra.gmra.mxu0 %vm419_vm0, %v385_v28 }
  0x6c   :  { %627 = vmatpush.bf16.msrb.mxu0 %v1815_v26  ;;  %1520 = vmatmul.msk.bf16.vlgmr.msra.gmra.mxu1 %vm419_vm0, %v385_v28 }
  0x6d   :  { %678 = vmatpush.bf16.msrb.mxu1 %v1819_v27  ;;  %1538 = vmatmul.msk.bf16.vlgmr.msra.gmra.mxu2 %vm419_vm0, %v385_v28 }
  0x6e   :  { %1555 = vmatmul.msk.bf16.vlgmr.msra.gmra.mxu3 %vm419_vm0, %v2144_v29 }
  0x70   :  { %628 = vmatpush.bf16.msrb.mxu0 %v1814_v30 }
  0x71   :  { %679 = vmatpush.bf16.msrb.mxu1 %v1818_v31 }
  0x74   :  { %629 = vmatpush.bf16.msrb.mxu0 %v1813_v32 }
  0x75   :  { %680 = vmatpush.bf16.msrb.mxu1 %v1817_v33 }
  0x78   :  { %630 = vmatpush.bf16.msrb.mxu0 %v1812_v34 }
  0x79   :  { %681 = vmatpush.bf16.msrb.mxu1 %v1816_v35 }
  0x7b   :  { %1573 = vmatmul.msk.bf16.vlgmr.msrb.gmra.mxu0 %vm419_vm0, %v2144_v29 }
  0x7c   :  { %1591 = vmatmul.msk.bf16.vlgmr.msrb.gmra.mxu1 %vm419_vm0, %v2144_v29 }
  0xe8   :  { %v2155_v36 = vpop.f32.mrf.mxu0 }
  0xe9   :  { %v2157_v37 = vpop.f32.mrf.mxu1 }
  0xf0   :  { %v529_v40 = vpop.f32.mrf.mxu2  ;;  %v434_v42 = vpop.f32.mrf.mxu0 }
  0xf1   :  { %v581_v41 = vpop.f32.mrf.mxu3  ;;  %v480_v43 = vpop.f32.mrf.mxu1  ;;  %v2165_v44 = vadd.f32 %v1869_v38, %v529_v40 }
  0xf2   :  { %v582_v45 = vadd.f32 %v1870_v39, %v581_v41 }
  0xf8   :  { %v531_v48 = vpop.f32.mrf.mxu2  ;;  %v632_v50 = vpop.f32.mrf.mxu0 }
  0xf9   :  { %v583_v49 = vpop.f32.mrf.mxu3  ;;  %v683_v51 = vpop.f32.mrf.mxu1  ;;  %v633_v52 = vadd.f32 %v1871_v46, %v632_v50 }
  0xfa   :  { %v2173_v53 = vadd.f32 %v1872_v47, %v683_v51 }
 0x100   :  { %v634_v54 = vpop.f32.mrf.mxu0 }
 0x101   :  { %v685_v55 = vpop.f32.mrf.mxu1 }
 0x102   :  { %2012 = dma.done.wait [#allocation6], 16 }
 0x103   :  { %2013 = vsyncadd [#allocation6], 4294967280 }
 0x104   :  { %2014 = dma.done.wait [#allocation6 + $0x1], 16 }
 0x105   :  { %2015 = vsyncadd [#allocation6 + $0x1], 4294967280 }
 0x106   :  { %2016 = dma.done.wait [#allocation6 + $0x2], 16 }
 0x107   :  { %2017 = vsyncadd [#allocation6 + $0x2], 4294967280 }
 0x108   :  { %2018 = dma.done.wait [#allocation6 + $0x3], 16 }
 0x109   :  { %2019 = vsyncadd [#allocation6 + $0x3], 4294967280 }
 0x10a   :  { %2020 = dma.done.wait [#allocation6 + $0x4], 16 }
 0x10b   :  { %2021 = vsyncadd [#allocation6 + $0x4], 4294967280 }
 0x10c   :  { %2022 = dma.done.wait [#allocation6 + $0x5], 16 }
 0x10d   :  { %2023 = vsyncadd [#allocation6 + $0x5], 4294967280 }
 0x10e   :  { %2024 = dma.done.wait [#allocation6 + $0x6], 16 }
 0x10f   :  { %2025 = vsyncadd [#allocation6 + $0x6], 4294967280 }
 0x110   :  { %2026 = dma.done.wait [#allocation6 + $0x7], 16 }
 0x111   :  { %2027 = vsyncadd [#allocation6 + $0x7], 4294967280  ;;  %v1821_v56 = vld [vmem:[%s2289_s4 + $0x8] sm:$0xff]  ;;  %v1823_v57 = vld [vmem:[%s2289_s4 + $0x18] sm:$0xff]  ;;  %vm1202_vm1 = vcmask 257024   ;;  %vm722_vm2 = vcmask 261120  }
 0x112   :  { %v1820_v58 = vld [vmem:[%s2289_s4] sm:$0xff]  ;;  %v1822_v59 = vld [vmem:[%s2289_s4 + $0x10] sm:$0xff]  ;;  %v1825_v61 = vld [vmem:[%s2289_s4 + $0x28] sm:$0xff]  ;;  %732 = vmatpush.bf16.msrb.mxu2 %v1821_v56  ;;  %762 = vmatpush.bf16.msrb.mxu3 %v1823_v57  ;;  %vm1204_vm11 = vcmask 519168   ;;  %s1366_s27 = sshll.u32 %s2296_s11, 4  ;;  %s2040_s13 = smov [#allocation14]   ;;  %s1367_s27 = int_to_ptr.hbm [resolvable:$true] %s1366_s27 }
 0x113   :  { %v704_v60 = vld [vmem:[#allocation2] sm:$0xff]  ;;  %792 = vmatpush.bf16.msra.mxu0 %v1825_v61  ;;  %v1840_v14 = vld [vmem:[#allocation12 + $0x130] sm:$0xff]  ;;  %v1839_v18 = vld [vmem:[#allocation12 + $0x128] sm:$0xff]  ;;  %1205 = vst.msk [vmem:[#allocation4] sm:$0xf] %vm1204_vm11, %v2144_v29  ;;  %s1354_s1 = sshll.u32 %s2040_s13, 4  ;;  %s1355_s1 = int_to_ptr.vmem [resolvable:$true] %s1354_s1 }
 0x114   :  { %v705_v62 = vpack.c.bf16 %v704_v60, %v704_v60  ;;  %v1824_v63 = vld [vmem:[%s2289_s4 + $0x20] sm:$0xff]  ;;  %v1828_v15 = vld [vmem:[#allocation12 + $0xd0] sm:$0xff]  ;;  %v1827_v21 = vld [vmem:[#allocation12 + $0xc8] sm:$0xff]  ;;  %s1356_s15 = sshll.u32 %s2295_s10, 4  ;;  %s1357_s15 = int_to_ptr.hbm [resolvable:$true] %s1356_s15 }
 0x115   :  { %v1841_v5 = vld [vmem:[#allocation12 + $0x138] sm:$0xff]  ;;  %v1832_v16 = vld [vmem:[#allocation12 + $0xf0] sm:$0xff]  ;;  %v1831_v23 = vld [vmem:[#allocation12 + $0xe8] sm:$0xff] }
 0x116   :  { %1203 = vst.msk [vmem:[#allocation3] sm:$0xf] %vm1202_vm1, %v705_v62  ;;  %733 = vmatpush.bf16.msrb.mxu2 %v1820_v58  ;;  %763 = vmatpush.bf16.msrb.mxu3 %v1822_v59  ;;  %v1829_v6 = vld [vmem:[#allocation12 + $0xd8] sm:$0xff]  ;;  %v1836_v17 = vld [vmem:[#allocation12 + $0x110] sm:$0xff]  ;;  %v1835_v24 = vld [vmem:[#allocation12 + $0x108] sm:$0xff] }
 0x117   :  { %793 = vmatpush.bf16.msra.mxu0 %v1824_v63  ;;  %v1833_v7 = vld [vmem:[#allocation12 + $0xf8] sm:$0xff]  ;;  %895 = vmatpush.bf16.msra.mxu1 %v1829_v6  ;;  %v1838_v25 = vld [vmem:[#allocation12 + $0x120] sm:$0xff]  ;;  %v1844_v38 = vld [vmem:[#allocation12 + $0x150] sm:$0xff] }
 0x118   :  { %v1837_v8 = vld [vmem:[#allocation12 + $0x118] sm:$0xff]  ;;  %v1826_v27 = vld [vmem:[#allocation12 + $0xc0] sm:$0xff]  ;;  %v1848_v39 = vld [vmem:[#allocation12 + $0x170] sm:$0xff] }
 0x119   :  { %1600 = vmatmul.msk.bf16.vlgmr.msrb.gmra.mxu2 %vm722_vm2, %v705_v62  ;;  %1613 = vmatmul.msk.bf16.vlgmr.msrb.gmra.mxu3 %vm722_vm2, %v705_v62  ;;  %v2200_v26 = vld [vmem:[#allocation9 + $0x8] sm:$0xff]  ;;  %v1830_v28 = vld [vmem:[#allocation12 + $0xe0] sm:$0xff]  ;;  %v1847_v47 = vld [vmem:[#allocation12 + $0x168] sm:$0xff] }
 0x11a   :  { %1626 = vmatmul.msk.bf16.vlgmr.msra.gmra.mxu0 %vm722_vm2, %v705_v62  ;;  %946 = vmatpush.bf16.msra.mxu2 %v1833_v7  ;;  %v1834_v31 = vld [vmem:[#allocation12 + $0x100] sm:$0xff]  ;;  %v2204_v34 = vpack.c.bf16 %v2200_v26, %v2200_v26 }
 0x11b   :  { %1046 = vmatpush.bf16.msrb.mxu0 %v1841_v5  ;;  %997 = vmatpush.bf16.msra.mxu3 %v1837_v8  ;;  %v1842_v54 = vld [vmem:[#allocation12 + $0x140] sm:$0xff] }
 0x11c   :  { %896 = vmatpush.bf16.msra.mxu1 %v1828_v15 }
 0x11e   :  { %947 = vmatpush.bf16.msra.mxu2 %v1832_v16 }
 0x11f   :  { %1047 = vmatpush.bf16.msrb.mxu0 %v1840_v14  ;;  %998 = vmatpush.bf16.msra.mxu3 %v1836_v17  ;;  %v1859_v17 = vld [vmem:[%s2292_s7 + $0x38] sm:$0xff] }
 0x120   :  { %897 = vmatpush.bf16.msra.mxu1 %v1827_v21  ;;  %v1858_v21 = vld [vmem:[%s2292_s7 + $0x30] sm:$0xff] }
 0x122   :  { %948 = vmatpush.bf16.msra.mxu2 %v1831_v23 }
 0x123   :  { %1048 = vmatpush.bf16.msrb.mxu0 %v1839_v18  ;;  %999 = vmatpush.bf16.msra.mxu3 %v1835_v24  ;;  %v1854_v24 = vld [vmem:[%s2293_s8] sm:$0xff] }
 0x124   :  { %898 = vmatpush.bf16.msra.mxu1 %v1826_v27 }
 0x126   :  { %949 = vmatpush.bf16.msra.mxu2 %v1830_v28 }
 0x127   :  { %1049 = vmatpush.bf16.msrb.mxu0 %v1838_v25  ;;  %1000 = vmatpush.bf16.msra.mxu3 %v1834_v31  ;;  %v1853_v31 = vld [vmem:[%s2292_s7 + $0x18] sm:$0xff] }
 0x12a   :  { %1699 = vmatmul.msk.bf16.vlgmr.msrb.gmra.mxu0 %vm419_vm0, %v2204_v34 }
 0x12b   :  { %1283 = vmatpush.bf16.msra.mxu0 %v1853_v31 }
 0x197   :  { %v2196_v0 = vpop.f32.mrf.mxu0 }
 0x198   :  { %v796_v57 = vadd.f32 %v2196_v0, %v2173_v53 }
 0x19c   :  { %v735_v1 = vpop.f32.mrf.mxu2  ;;  %v765_v2 = vpop.f32.mrf.mxu3 }
 0x19d   :  { %v736_v3 = vadd.f32 %v735_v1, %v582_v45  ;;  %v766_v4 = vadd.f32 %v765_v2, %v633_v52  ;;  %v1843_v45 = vld [vmem:[#allocation12 + $0x148] sm:$0xff]  ;;  %v1846_v1 = vld [vmem:[#allocation12 + $0x160] sm:$0xff] }
 0x19f   :  { %v799_v9 = vadd.f32 %v736_v3, %v2155_v36  ;;  %v819_v10 = vadd.f32 %v766_v4, %v2157_v37  ;;  %v797_v11 = vpop.f32.mrf.mxu0  ;;  %v1845_v36 = vld [vmem:[#allocation12 + $0x158] sm:$0xff] }
 0x1a0   :  { %v1849_v37 = vld [vmem:[#allocation12 + $0x178] sm:$0xff]  ;;  %1092 = vmatpush.bf16.msrb.mxu1 %v1845_v36 }
 0x1a1   :  { %v1627_v12 = vmul.f32 -1.442695, %v799_v9  ;;  %v1628_v13 = vmul.f32 -1.442695, %v819_v10  ;;  %1143 = vmatpush.bf16.msrb.mxu2 %v1849_v37  ;;  %v1852_v37 = vld [vmem:[%s2292_s7 + $0x10] sm:$0xff] }
 0x1a2   :  { %1284 = vmatpush.bf16.msra.mxu0 %v1852_v37 }
 0x1a3   :  { %1878 = vpow2.f32 %v1627_v12 }
 0x1a4   :  { %1880 = vpow2.f32 %v1628_v13  ;;  %v737_v19 = vpop.f32.mrf.mxu2  ;;  %v767_v20 = vpop.f32.mrf.mxu3  ;;  %1093 = vmatpush.bf16.msrb.mxu1 %v1844_v38  ;;  %v1856_v38 = vld [vmem:[%s2292_s7 + $0x20] sm:$0xff] }
 0x1a5   :  { %1144 = vmatpush.bf16.msrb.mxu2 %v1848_v39  ;;  %v1855_v19 = vld [vmem:[%s2293_s8 + $0x8] sm:$0xff]  ;;  %v1874_v20 = vld [vmem:[%s2291_s6 + $0x5] ss:$0 sm:$0xff] }
 0x1a6   :  { %1244 = vmatpush.bf16.msrb.mxu3 %v1855_v19  ;;  %v1877_v19 = vld [vmem:[%s2294_s9] ss:$0 sm:$0xff] }
 0x1a8   :  { %1094 = vmatpush.bf16.msrb.mxu1 %v1843_v45 }
 0x1a9   :  { %v1879_v30 = vpop.eup %1878  ;;  %1145 = vmatpush.bf16.msrb.mxu2 %v1847_v47  ;;  %v1876_v47 = vld [vmem:[%s2291_s6 + $0x7] ss:$0 sm:$0xff] }
 0x1aa   :  { %v1881_v32 = vpop.eup %1880  ;;  %v803_v33 = vadd.f32 1.0, %v1879_v30  ;;  %1245 = vmatpush.bf16.msrb.mxu3 %v1854_v24 }
 0x1ab   :  { %v823_v35 = vadd.f32 1.0, %v1881_v32  ;;  %v1857_v32 = vld [vmem:[%s2292_s7 + $0x28] sm:$0xff] }
 0x1ac   :  { %1882 = vrcp.f32 %v803_v33  ;;  %v815_v49 = vand.u32 2147483648, %v803_v33  ;;  %v813_v51 = vand.u32 2147483647, %v803_v33  ;;  %vm809_vm4 = vweird.f32 %v803_v33  ;;  %1095 = vmatpush.bf16.msrb.mxu1 %v1842_v54 }
 0x1ad   :  { %1884 = vrcp.f32 %v823_v35  ;;  %vm829_vm7 = vweird.f32 %v823_v35  ;;  %v835_v62 = vand.u32 2147483648, %v823_v35  ;;  %v833_v63 = vand.u32 2147483647, %v823_v35  ;;  %1146 = vmatpush.bf16.msrb.mxu2 %v1846_v1 }
 0x1ae   :  { %v816_v56 = vor.u32 1.1754944e-38, %v815_v49  ;;  %vm814_vm6 = vcmp.eq.f32.partialorder %v813_v51, 8.507059e+37 }
 0x1af   :  { %v836_v4 = vor.u32 1.1754944e-38, %v835_v62  ;;  %vm834_vm10 = vcmp.eq.f32.partialorder %v833_v63, 8.507059e+37 }
 0x1b2   :  { %v1883_v40 = vpop.eup %1882 }
 0x1b3   :  { %v1885_v41 = vpop.eup %1884  ;;  %v805_v42 = vmul.f32 %v1883_v40, %v803_v33  ;;  %vm810_vm3 = vweird.f32 %v1883_v40 }
 0x1b4   :  { %v825_v43 = vmul.f32 %v1885_v41, %v823_v35  ;;  %vm811_vm5 = vmor %vm809_vm4, %vm810_vm3  ;;  %vm830_vm8 = vweird.f32 %v1885_v41  ;;  %v1217_v35 = vld [vmem:[#allocation3] sm:$0xf] }
 0x1b5   :  { %v806_v46 = vsub.f32 1.0, %v805_v42  ;;  %vm831_vm9 = vmor %vm829_vm7, %vm830_vm8  ;;  %v1292_v42 = vld [vmem:[#allocation4] sm:$0xf] }
 0x1b6   :  { %v826_v48 = vsub.f32 1.0, %v825_v43 }
 0x1b7   :  { %v807_v50 = vmul.f32 %v1883_v40, %v806_v46  ;;  %v1850_v46 = vld [vmem:[%s2292_s7] sm:$0xff] }
 0x1b8   :  { %v827_v52 = vmul.f32 %v1885_v41, %v826_v48 }
 0x1b9   :  { %v808_v55 = vadd.f32 %v1883_v40, %v807_v50 }
 0x1ba   :  { %v828_v60 = vadd.f32 %v1885_v41, %v827_v52 }
 0x1bb   :  { %v812_v58 = vsel %vm811_vm5, %v1883_v40, %v808_v55 }
 0x1bc   :  { %v817_v59 = vsel %vm814_vm6, %v816_v56, %v812_v58  ;;  %v832_v3 = vsel %vm831_vm9, %v1885_v41, %v828_v60  ;;  %v1851_v41 = vld [vmem:[%s2292_s7 + $0x8] sm:$0xff] }
 0x1bd   :  { %v839_v61 = vmul.f32 %v817_v59, %v2165_v44  ;;  %v837_v53 = vsel %vm834_vm10, %v836_v4, %v832_v3  ;;  %v1051_v44 = vpop.f32.mrf.mxu0  ;;  %1285 = vmatpush.bf16.msra.mxu0 %v1851_v41  ;;  %v1875_v59 = vld [vmem:[%s2291_s6 + $0x6] ss:$0 sm:$0xff] }
 0x1be   :  { %v842_v0 = vsub.f32 1.0, %v837_v53  ;;  %v844_v7 = vmul.f32 %v837_v53, %v2137_v22  ;;  %v1873_v22 = vld [vmem:[%s2291_s6 + $0x4] ss:$0 sm:$0xff]  ;;  %s2039_s6 = smov [#allocation15]  }
 0x1bf   :  { %v840_v2 = vadd.f32 %v839_v61, %v796_v57  ;;  %s1364_s2 = sshll.u32 %s2039_s6, 4  ;;  %s1365_s2 = int_to_ptr.vmem [resolvable:$true] %s1364_s2 }
 0x1c1   :  { %1886 = vtanh.f32 %v840_v2  ;;  %1286 = vmatpush.bf16.msra.mxu0 %v1850_v46 }
 0x1c5   :  { %v1053_v10 = vpop.f32.mrf.mxu0 }
 0x1c7   :  { %v1887_v5 = vpop.eup %1886 }
 0x1c8   :  { %v843_v6 = vmul.f32 %v1887_v5, %v842_v0 }
 0x1ca   :  { %v845_v8 = vadd.f32 %v844_v7, %v843_v6 }
 0x1cc   :  { %v849_v9 = vpack.c.bf16 %v845_v8, %v845_v8  ;;  %1199 = vst.msk [vmem:[#allocation15] sm:$0xff] %vm419_vm0, %v845_v8 }
 0x1ce   :  { %1646 = vmatmul.msk.bf16.vlgmr.msra.gmra.mxu1 %vm419_vm0, %v849_v9  ;;  %1664 = vmatmul.msk.bf16.vlgmr.msra.gmra.mxu2 %vm419_vm0, %v849_v9 }
 0x1cf   :  { %1682 = vmatmul.msk.bf16.vlgmr.msra.gmra.mxu3 %vm419_vm0, %v849_v9  ;;  %1333 = vmatpush.bf16.msra.mxu1 %v1859_v17 }
 0x1d3   :  { %1334 = vmatpush.bf16.msra.mxu1 %v1858_v21 }
 0x1d7   :  { %1335 = vmatpush.bf16.msra.mxu1 %v1857_v32 }
 0x1db   :  { %1336 = vmatpush.bf16.msra.mxu1 %v1856_v38 }
 0x1de   :  { %1716 = vmatmul.msk.bf16.vlgmr.msrb.gmra.mxu1 %vm419_vm0, %v2204_v34  ;;  %1734 = vmatmul.msk.bf16.vlgmr.msrb.gmra.mxu2 %vm419_vm0, %v2204_v34 }
 0x1df   :  { %1745 = vmatmul.msk.bf16.vlgmr.msrb.gmra.mxu3 %vm722_vm2, %v1217_v35 }
 0x1ee   :  { %1787 = vmatmul.msk.bf16.vlgmr.msra.gmra.mxu1 %vm419_vm0, %v1292_v42 }
 0x24b   :  { %v900_v11 = vpop.f32.mrf.mxu1 }
 0x24c   :  { %v901_v12 = vadd.f32 %v1873_v22, %v900_v11 }
 0x24e   :  { %v1152_v13 = vadd.f32 %v1051_v44, %v901_v12 }
 0x250   :  { %v1735_v14 = vmul.f32 -1.442695, %v1152_v13 }
 0x251   :  { %v951_v15 = vpop.f32.mrf.mxu2 }
 0x252   :  { %1888 = vpow2.f32 %v1735_v14  ;;  %v2223_v16 = vpop.f32.mrf.mxu3  ;;  %v952_v28 = vadd.f32 %v1874_v20, %v951_v15 }
 0x253   :  { %v902_v18 = vpop.f32.mrf.mxu1  ;;  %v1003_v63 = vadd.f32 %v1875_v59, %v2223_v16 }
 0x258   :  { %v1889_v23 = vpop.eup %1888 }
 0x259   :  { %v1156_v25 = vadd.f32 1.0, %v1889_v23  ;;  %v953_v27 = vpop.f32.mrf.mxu2 }
 0x25a   :  { %v1004_v30 = vpop.f32.mrf.mxu3 }
 0x25b   :  { %1890 = vrcp.f32 %v1156_v25  ;;  %v1097_v33 = vpop.f32.mrf.mxu1  ;;  %v1168_v48 = vand.u32 2147483648, %v1156_v25  ;;  %v1166_v51 = vand.u32 2147483647, %v1156_v25  ;;  %vm1162_vm13 = vweird.f32 %v1156_v25 }
 0x25c   :  { %v1172_v34 = vadd.f32 %v1097_v33, %v952_v28 }
 0x25d   :  { %v1169_v56 = vor.u32 1.1754944e-38, %v1168_v48  ;;  %vm1167_vm15 = vcmp.eq.f32.partialorder %v1166_v51, 8.507059e+37 }
 0x25e   :  { %v1736_v36 = vmul.f32 -1.442695, %v1172_v34 }
 0x260   :  { %1892 = vpow2.f32 %v1736_v36 }
 0x261   :  { %v1891_v39 = vpop.eup %1890  ;;  %v1148_v29 = vpop.f32.mrf.mxu2 }
 0x262   :  { %v1158_v40 = vmul.f32 %v1891_v39, %v1156_v25  ;;  %vm1163_vm12 = vweird.f32 %v1891_v39  ;;  %v1149_v55 = vadd.f32 %v1876_v47, %v1148_v29 }
 0x263   :  { %v1099_v43 = vpop.f32.mrf.mxu1  ;;  %vm1164_vm14 = vmor %vm1162_vm13, %vm1163_vm12 }
 0x264   :  { %v1159_v45 = vsub.f32 1.0, %v1158_v40 }
 0x266   :  { %v1893_v49 = vpop.eup %1892  ;;  %v1160_v50 = vmul.f32 %v1891_v39, %v1159_v45 }
 0x267   :  { %v1176_v52 = vadd.f32 1.0, %v1893_v49 }
 0x268   :  { %v1161_v54 = vadd.f32 %v1891_v39, %v1160_v50 }
 0x269   :  { %1894 = vrcp.f32 %v1176_v52  ;;  %v1150_v57 = vpop.f32.mrf.mxu2  ;;  %v1188_v4 = vand.u32 2147483648, %v1176_v52  ;;  %v1186_v0 = vand.u32 2147483647, %v1176_v52  ;;  %vm1182_vm2 = vweird.f32 %v1176_v52 }
 0x26a   :  { %v1165_v58 = vsel %vm1164_vm14, %v1891_v39, %v1161_v54 }
 0x26b   :  { %v1170_v60 = vsel %vm1167_vm15, %v1169_v56, %v1165_v58  ;;  %v1189_v6 = vor.u32 1.1754944e-38, %v1188_v4  ;;  %vm1187_vm4 = vcmp.eq.f32.partialorder %v1186_v0, 8.507059e+37  ;;  %v1338_v14 = vpop.f32.mrf.mxu1 }
 0x26c   :  { %v1192_v61 = vmul.f32 %v1170_v60, %v1149_v55 }
 0x26e   :  { %v1193_v2 = vadd.f32 %v1192_v61, %v1003_v63 }
 0x26f   :  { %v1895_v62 = vpop.eup %1894 }
 0x270   :  { %v1178_v1 = vmul.f32 %v1895_v62, %v1176_v52  ;;  %vm1183_vm1 = vweird.f32 %v1895_v62  ;;  %1896 = vtanh.f32 %v1193_v2 }
 0x271   :  { %vm1184_vm3 = vmor %vm1182_vm2, %vm1183_vm1 }
 0x272   :  { %v1179_v3 = vsub.f32 1.0, %v1178_v1 }
 0x273   :  { %v1340_v16 = vpop.f32.mrf.mxu1 }
 0x274   :  { %v1180_v53 = vmul.f32 %v1895_v62, %v1179_v3 }
 0x276   :  { %v1181_v5 = vadd.f32 %v1895_v62, %v1180_v53  ;;  %v1897_v44 = vpop.eup %1896 }
 0x278   :  { %v1185_v7 = vsel %vm1184_vm3, %v1895_v62, %v1181_v5 }
 0x279   :  { %v1190_v8 = vsel %vm1187_vm4, %v1189_v6, %v1185_v7 }
 0x27a   :  { %v1195_v9 = vsub.f32 1.0, %v1190_v8  ;;  %v1197_v22 = vmul.f32 %v1190_v8, %v2200_v26  ;;  %v1247_v26 = vpop.f32.mrf.mxu3 }
 0x27c   :  { %v1196_v10 = vmul.f32 %v1897_v44, %v1195_v9 }
 0x27e   :  { %v1198_v11 = vadd.f32 %v1197_v22, %v1196_v10 }
 0x280   :  { %v1206_v12 = vpack.c.bf16 %v1198_v11, %v1198_v11  ;;  %1201 = vst.msk [vmem:[#allocation15 + $0x8] sm:$0xff] %vm419_vm0, %v1198_v11 }
 0x281   :  { %1372 = dma.vmem_to_hbm [thread:$0]  %s1365_s2, 256, %s1367_s27, [#allocation16], %s2034_s28, %s2034_s28, %s2035_s29  }
 0x282   :  { %1207 = vst.msk [vmem:[#allocation5] sm:$0xf] %vm1204_vm11, %v1206_v12  ;;  %v1249_v15 = vpop.f32.mrf.mxu3 }
 0x289   :  { %v1208_v13 = vld [vmem:[#allocation5] sm:$0xf] }
 0x28a   :  { %1762 = vmatmul.msk.bf16.vlgmr.msra.gmra.mxu0 %vm419_vm0, %v1208_v13 }
 0x307   :  { %v1288_v17 = vpop.f32.mrf.mxu0 }
 0x308   :  { %v1289_v18 = vadd.f32 %v1288_v17, %v1247_v26 }
 0x30a   :  { %v1342_v20 = vadd.f32 %v1338_v14, %v1289_v18 }
 0x30c   :  { %v1347_v21 = vadd.f32 %v1877_v19, %v1342_v20 }
 0x30e   :  { %1348 = vst [vmem:[#allocation14] sm:$0xff] %v1347_v21 }
 0x30f   :  { %v1290_v23 = vpop.f32.mrf.mxu0  ;;  %1359 = dma.vmem_to_hbm [thread:$0]  %s1355_s1, 128, %s1357_s15, [#allocation11]  }
 0x310   :  { %2028 = dma.done.wait [#allocation11], 128  }
 0x311   :  { %2029 = vsyncadd [#allocation11], 4294967168 }
 0x312   :  { %2030 = dma.done.wait [#allocation16], 256  }
 0x313   :  { %2031 = vsyncadd [#allocation16], 4294967040 }
 0x314   :  { %1381 = vsyncpa [#allocation10], 1 }
 0x315   :  { %1382 = vsyncpa [#allocation13], 1 }
 0x316   :  { %1383 = vsyncpa [#allocation11], 1 }
 0x317   :  { %1384 = vsyncpa [#allocation16], 1 }
 0x318   :  { %1385 = vsyncmov [#allocation6] }
 0x31b   :  { %s1386_s9 = vpop.sfrf %1385 }
 0x31c   :  { %p1788_p0 = scmp.ne.s32.totalorder %s1386_s9, 0 }
 0x31e   :  { %1390 = shalt.err (%p1788_p0)  }
 0x31f   :  { %1392 = vsyncmov [#allocation6 + $0x1] }
 0x322   :  { %s1393_s10 = vpop.sfrf %1392 }
 0x323   :  { %p1789_p1 = scmp.ne.s32.totalorder %s1393_s10, 0 }
 0x325   :  { %1397 = shalt.err (%p1789_p1)  }
 0x326   :  { %1399 = vsyncmov [#allocation6 + $0x2] }
 0x329   :  { %s1400_s28 = vpop.sfrf %1399 }
 0x32a   :  { %p1790_p2 = scmp.ne.s32.totalorder %s1400_s28, 0 }
 0x32c   :  { %1404 = shalt.err (%p1790_p2)  }
 0x32d   :  { %1406 = vsyncmov [#allocation6 + $0x3] }
 0x330   :  { %s1407_s29 = vpop.sfrf %1406 }
 0x331   :  { %p1791_p3 = scmp.ne.s32.totalorder %s1407_s29, 0 }
 0x333   :  { %1411 = shalt.err (%p1791_p3)  }
 0x334   :  { %1413 = vsyncmov [#allocation6 + $0x4] }
 0x337   :  { %s1414_s5 = vpop.sfrf %1413 }
 0x338   :  { %p1792_p4 = scmp.ne.s32.totalorder %s1414_s5, 0 }
 0x33a   :  { %1418 = shalt.err (%p1792_p4)  }
 0x33b   :  { %1420 = vsyncmov [#allocation6 + $0x5] }
 0x33e   :  { %s1421_s16 = vpop.sfrf %1420 }
 0x33f   :  { %p1793_p5 = scmp.ne.s32.totalorder %s1421_s16, 0 }
 0x341   :  { %1425 = shalt.err (%p1793_p5)  }
 0x342   :  { %1427 = vsyncmov [#allocation6 + $0x6] }
 0x345   :  { %s1428_s17 = vpop.sfrf %1427 }
 0x346   :  { %p1794_p6 = scmp.ne.s32.totalorder %s1428_s17, 0 }
 0x348   :  { %1432 = shalt.err (%p1794_p6)  }
 0x349   :  { %1434 = vsyncmov [#allocation6 + $0x7] }
 0x34c   :  { %s1435_s8 = vpop.sfrf %1434 }
 0x34d   :  { %p1795_p7 = scmp.ne.s32.totalorder %s1435_s8, 0 }
 0x34f   :  { %1439 = shalt.err (%p1795_p7)  }

</bundles_post_ra>
